<compile_context>
chip_gen: v7x
topology: tpu7x:2x2x1
jax: 0.10.0
libtpu: 0.0.40
codegen_flags: <defaults>
</compile_context>

<pallas_src>
import functools

import jax
import jax.numpy as jnp
from jax import lax
from jax.experimental import pallas as pl
from jax.experimental.pallas import tpu as pltpu

_TILE_R = 256   # anchor rows per row tile (only >128 because cols are tiled)
_TILE_C = 512   # contrast columns per inner grid step


def _sup_patch_nce_kernel(lhs_ref, rhs_ref, lab_col_ref, lab_row_ref,
                          col_id_ref, out_ref, z_acc, ps_acc, pc_acc, *,
                          n_valid, tile_r, inv_t):
    """Grid = (row tiles [parallel], col tiles [arbitrary]); one (TILE_R, TILE_C) block."""
    i = pl.program_id(0)
    j = pl.program_id(1)

    @pl.when(j == 0)
    def _init():
        z_acc[...] = jnp.zeros_like(z_acc)
        ps_acc[...] = jnp.zeros_like(ps_acc)
        pc_acc[...] = jnp.zeros_like(pc_acc)

    # Scaled cosine-similarity logits straight off the MXU (f32 accumulation).
    # LHS rows are L2-normalized * (1/T); RHS columns are L2-normalized.
    logits = jnp.dot(lhs_ref[...], rhs_ref[...],
                     preferred_element_type=jnp.float32)      # (tile_r, tile_c)

    # Masks: col_id carries -1 on padded columns, so pad + diagonal exclusion
    # is one (tile_r, 1) iota, two compares and one AND; no (tile_r, tile_c)
    # int32 iota temporaries are materialized.
    rid = i * tile_r + lax.broadcasted_iota(jnp.int32, (tile_r, 1), 0)
    col_id = col_id_ref[...]                                   # (1, tile_c)
    in_denom = (col_id != rid) & (col_id >= 0)                 # drop self & pad
    pos = in_denom & (lab_col_ref[...] == lab_row_ref[...])    # supervised mask

    # Constant analytic shift: raw logits <= 1/T up to bf16 rounding, so exp()
    # arguments stay ~<= 0 (at worst exp(~0.1) on the excluded diagonal) and
    # the shift cancels exactly in the fused formula below -- no row-max pass.
    e = jnp.exp(logits - inv_t)
    z_acc[...] += jnp.sum(jnp.where(in_denom, e, 0.0), axis=1, keepdims=True)
    ps_acc[...] += jnp.sum(jnp.where(pos, logits, 0.0), axis=1, keepdims=True)
    pc_acc[...] += jnp.sum(pos.astype(jnp.float32), axis=1, keepdims=True)

    @pl.when(j == pl.num_programs(1) - 1)
    def _finalize():
        # Fused mean_log_prob_pos with the shift folded back in analytically:
        #   sum(pos*raw)/cnt - shift - log(sum(valid*exp(raw - shift)))
        # pos_cnt clamp only guards padded anchor rows (real anchors always
        # have the cross-view positive); padded rows are masked out of the
        # per-tile partial sum, so sentinels are never relied upon.
        mlpp = (ps_acc[...] / jnp.maximum(pc_acc[...], 1.0)
                - inv_t - jnp.log(z_acc[...]))                 # (tile_r, 1)
        row_valid = rid < n_valid
        tile_sum = jnp.sum(jnp.where(row_valid, mlpp, 0.0))
        # Lane-dense (8, 128)-aligned store: broadcast the per-tile partial
        # sum (the wrapper reads out[i, 0, 0]); avoids masked 1-lane stores
        # and sublane-strided DMA of a (tile_r, 1) output block.
        out_ref[...] = jnp.broadcast_to(tile_sum, (8, 128))


def _round_up(x, m):
    return (x + m - 1) // m * m


def _nearest_resize_2d(x, size):
    """torch F.interpolate(mode='nearest') on (B, 1, H, W): src = floor(dst*in/out).
    `size` follows torch semantics (out_rows, out_cols); the reference unpacks
    coords_range as (w, h) and feeds it to interpolate in that same order."""
    _, _, h_in, w_in = x.shape
    oh, ow = size
    ri = (jnp.arange(oh) * h_in // oh).astype(jnp.int32)
    ci = (jnp.arange(ow) * w_in // ow).astype(jnp.int32)
    return x[:, :, ri][:, :, :, ci]


def sup_patch_nce_loss(features, labels_seg, labels_coords, coords_range,
                       nce_T=0.07):
    """features: (n_views=2, num_patches, nc); labels_seg: (1, 1, H, W) NCHW;
    labels_coords: (num_patches, 2) int; coords_range: (H', W')."""
    n_views, num_patches, nc = features.shape
    assert n_views == 2, "only n_views == 2 supported (matches reference)"
    assert labels_seg.shape[0] == 1, "reference broadcasting assumes batch size 1"
    assert len(coords_range) == 2, "2-D path only"
    # TODO(synk): 3-D (H, W, D) coords_range branch not implemented (2-D path only).

    w, h = coords_range
    seg = _nearest_resize_2d(labels_seg.astype(jnp.float32), (w, h))[:, 0]
    labels = seg[0, labels_coords[:, 0], labels_coords[:, 1]]     # (num_patches,)

    n_total = n_views * num_patches
    tile_r = min(_TILE_R, _round_up(n_total, 128))
    tile_c = min(_TILE_C, _round_up(n_total, tile_r))   # multiple of tile_r
    n_pad = _round_up(n_total, tile_c)                  # multiple of both tiles
    pad = n_pad - n_total
    n_row_tiles = n_pad // tile_r
    n_col_tiles = n_pad // tile_c

    # O(N*C) prologue in plain JAX: L2-normalize once, fold 1/T into the
    # anchor operand, cast both MXU operands to bf16 (kernel accumulates f32).
    feat = features.reshape(n_total, nc).astype(jnp.float32)
    inv_norm = lax.rsqrt(jnp.maximum(jnp.sum(feat * feat, -1, keepdims=True),
                                     1e-12))
    fn = feat * inv_norm
    inv_t = float(1.0 / float(nce_T))
    lhs = jnp.pad((fn * inv_t).astype(jnp.bfloat16), ((0, pad), (0, 0)))  # (N_pad, C)
    rhs = jnp.pad(fn.T.astype(jnp.bfloat16), ((0, 0), (0, pad)))          # (C, N_pad)

    # Integer class ids.  NOTE: the reference compares float label values
    # directly; this is identical as long as segmentation labels are
    # integer-valued class ids (the usual case).
    labels_i = jnp.rint(labels).astype(jnp.int32)
    lab = jnp.pad(jnp.tile(labels_i, n_views), (0, pad), constant_values=-1)
    lab_col = lab.reshape(n_pad, 1)
    lab_row = lab.reshape(1, n_pad)
    # Column index per contrast sample, -1 sentinel on padded columns: the
    # kernel derives both pad-column and diagonal exclusion from this alone.
    col_id = jnp.where(jnp.arange(n_pad) < n_total,
                       jnp.arange(n_pad), -1).astype(jnp.int32).reshape(1, n_pad)

    kernel = functools.partial(_sup_patch_nce_kernel, n_valid=n_total,
                               tile_r=tile_r, inv_t=inv_t)
    out = pl.pallas_call(
        kernel,
        out_shape=jax.ShapeDtypeStruct((n_row_tiles, 8, 128), jnp.float32),
        grid=(n_row_tiles, n_col_tiles),
        in_specs=[
            pl.BlockSpec((tile_r, nc), lambda i, j: (i, 0)),    # anchor rows
            pl.BlockSpec((nc, tile_c), lambda i, j: (0, j)),    # contrast cols
            pl.BlockSpec((tile_r, 1), lambda i, j: (i, 0)),     # anchor labels
            pl.BlockSpec((1, tile_c), lambda i, j: (0, j)),     # contrast labels
            pl.BlockSpec((1, tile_c), lambda i, j: (0, j)),     # contrast col ids
        ],
        out_specs=pl.BlockSpec((None, 8, 128), lambda i, j: (i, 0, 0)),
        scratch_shapes=[pltpu.VMEM((tile_r, 1), jnp.float32),   # z (denominator)
                        pltpu.VMEM((tile_r, 1), jnp.float32),   # pos_sum
                        pltpu.VMEM((tile_r, 1), jnp.float32)],  # pos_cnt
        compiler_params=pltpu.CompilerParams(
            dimension_semantics=("parallel", "arbitrary")),
    )(lhs, rhs, lab_col, lab_row, col_id)

    # loss = mean over all (n_views * num_patches) anchors of -mean_log_prob_pos
    return -jnp.sum(out[:, 0, 0]) / n_total


def _reference_loss(features, labels_seg, labels_coords, coords_range, nce_T=0.07):
    """Pure-JAX (f32) mirror of the PyTorch forward, for a sanity check."""
    n_views, num_patches, nc = features.shape
    w, h = coords_range
    seg = _nearest_resize_2d(labels_seg.astype(jnp.float32), (w, h))[:, 0]
    labels = seg[0, labels_coords[:, 0], labels_coords[:, 1]]
    mask = (labels[:, None] == labels[None, :]).astype(jnp.float32)
    feat = features.reshape(n_views * num_patches, nc).astype(jnp.float32)
    fnrm = feat / jnp.maximum(jnp.linalg.norm(feat, axis=-1, keepdims=True), 1e-8)
    adc = (fnrm @ fnrm.T) / nce_T
    logits = adc - jnp.max(adc, axis=1, keepdims=True)
    mask = jnp.tile(mask, (n_views, n_views))
    n = n_views * num_patches
    logits_mask = 1.0 - jnp.eye(n, dtype=jnp.float32)
    mask = mask * logits_mask
    exp_logits = jnp.exp(logits) * logits_mask
    log_prob = logits - jnp.log(exp_logits.sum(1, keepdims=True))
    mean_log_prob_pos = (mask * log_prob).sum(1) / mask.sum(1)
    return jnp.mean(-mean_log_prob_pos)


def _check(key, num_patches, nc, hw_in, hw_out, nce_T):
    k_feat, k_seg, k_coord = jax.random.split(key, 3)
    n_views, bs = 2, 1
    coords_range = (hw_out, hw_out)
    features = jax.random.normal(k_feat, (n_views, num_patches, nc), jnp.float32)
    labels_seg = jax.random.randint(k_seg, (bs, 1, hw_in, hw_in), 0, 4).astype(jnp.float32)
    labels_coords = jax.random.randint(k_coord, (num_patches, 2), 0, hw_out,
                                       dtype=jnp.int32)

    loss = jax.block_until_ready(
        sup_patch_nce_loss(features, labels_seg, labels_coords, coords_range,
                           nce_T=nce_T))
    ref = jax.block_until_ready(
        _reference_loss(features, labels_seg, labels_coords, coords_range, nce_T))

    assert bool(jnp.isfinite(loss)), f"non-finite loss: {loss}"
    # bf16 MXU operands with 1/T pre-folded give ~1e-2-level relative error on
    # O(1/T)-magnitude logits; 2% relative tolerance on the scalar loss.
    assert abs(float(loss) - float(ref)) < 2e-2 * (1.0 + abs(float(ref))), \
        f"mismatch: pallas={float(loss)} ref={float(ref)}"


if __name__ == "__main__":
    key = jax.random.PRNGKey(0)
    k0, k1, k2 = jax.random.split(key, 3)
    # N = 2 * 64 = 128 -> single (128, 128) tile.
    _check(k0, num_patches=64, nc=32, hw_in=16, hw_out=16, nce_T=0.07)
    # N = 2 * 80 = 160 -> padded to 256; also exercises nearest downsample 32->16.
    _check(k1, num_patches=80, nc=32, hw_in=32, hw_out=16, nce_T=0.07)
    # N = 2 * 300 = 600 -> padded to 1024: grid (4 row tiles x 2 col tiles),
    # exercising the column-tiled accumulators and the parallel row axis.
    _check(k2, num_patches=300, nc=32, hw_in=16, hw_out=16, nce_T=0.07)
    print("KERNEL_OK")
</pallas_src>

<mosaic_0001>
module attributes {stable_mosaic.version = 11 : i64} {
  func.func @_sup_patch_nce_kernel(%arg0: i32, %arg1: i32, %arg2: memref<128x32xbf16, #tpu.memory_space<vmem>>, %arg3: memref<32x128xbf16, #tpu.memory_space<vmem>>, %arg4: memref<128x1xi32, #tpu.memory_space<vmem>>, %arg5: memref<1x128xi32, #tpu.memory_space<vmem>>, %arg6: memref<1x128xi32, #tpu.memory_space<vmem>>, %arg7: memref<1x8x128xf32, #tpu.memory_space<vmem>>, %arg8: memref<128x1xf32, #tpu.memory_space<vmem>>, %arg9: memref<128x1xf32, #tpu.memory_space<vmem>>, %arg10: memref<128x1xf32, #tpu.memory_space<vmem>>) attributes {dimension_semantics = [#tpu.dimension_semantics<parallel>, #tpu.dimension_semantics<arbitrary>], iteration_bounds = array<i64: 1, 1>, scalar_prefetch = 0 : i64, scratch_operands = 3 : i64, tpu.core_type = #tpu.core_type<tc>, window_params = [{transform_indices = @transform_0, window_bounds = array<i64: 128, 32>}, {transform_indices = @transform_1, window_bounds = array<i64: 32, 128>}, {transform_indices = @transform_2, window_bounds = array<i64: 128, 1>}, {transform_indices = @transform_3, window_bounds = array<i64: 1, 128>}, {transform_indices = @transform_4, window_bounds = array<i64: 1, 128>}, {transform_indices = @transform_5, window_bounds = array<i64: 1, 8, 128>}]} {
    %c0_i32 = arith.constant 0 : i32
    %0 = arith.cmpi eq, %arg1, %c0_i32 : i32
    %1 = arith.extui %0 : i1 to i32
    %c0_i32_0 = arith.constant 0 : i32
    %2 = arith.cmpi ne, %1, %c0_i32_0 : i32
    scf.if %2 {
      %cst_31 = arith.constant 0.000000e+00 : f32
      %51 = vector.broadcast %cst_31 : f32 to vector<128x1xf32>
      %c0_32 = arith.constant 0 : index
      %c0_33 = arith.constant 0 : index
      %52 = vector.load %arg8[%c0_32, %c0_33] : memref<128x1xf32, #tpu.memory_space<vmem>>, vector<128x1xf32>
      tpu.vector_store %arg8[%c0_32, %c0_33], %51 {strides = array<i32>} : memref<128x1xf32, #tpu.memory_space<vmem>>, vector<128x1xf32>,
      %cst_34 = arith.constant 0.000000e+00 : f32
      %53 = vector.broadcast %cst_34 : f32 to vector<128x1xf32>
      %c0_35 = arith.constant 0 : index
      %c0_36 = arith.constant 0 : index
      %54 = vector.load %arg9[%c0_35, %c0_36] : memref<128x1xf32, #tpu.memory_space<vmem>>, vector<128x1xf32>
      tpu.vector_store %arg9[%c0_35, %c0_36], %53 {strides = array<i32>} : memref<128x1xf32, #tpu.memory_space<vmem>>, vector<128x1xf32>,
      %cst_37 = arith.constant 0.000000e+00 : f32
      %55 = vector.broadcast %cst_37 : f32 to vector<128x1xf32>
      %c0_38 = arith.constant 0 : index
      %c0_39 = arith.constant 0 : index
      %56 = vector.load %arg10[%c0_38, %c0_39] : memref<128x1xf32, #tpu.memory_space<vmem>>, vector<128x1xf32>
      tpu.vector_store %arg10[%c0_38, %c0_39], %55 {strides = array<i32>} : memref<128x1xf32, #tpu.memory_space<vmem>>, vector<128x1xf32>,
    } else {
    }
    %c0 = arith.constant 0 : index
    %c0_1 = arith.constant 0 : index
    %3 = vector.load %arg2[%c0, %c0_1] : memref<128x32xbf16, #tpu.memory_space<vmem>>, vector<128x32xbf16>
    %c0_2 = arith.constant 0 : index
    %c0_3 = arith.constant 0 : index
    %4 = vector.load %arg3[%c0_2, %c0_3] : memref<32x128xbf16, #tpu.memory_space<vmem>>, vector<32x128xbf16>
    %cst = arith.constant dense<0.000000e+00> : vector<128x128xf32>
    %5 = tpu.matmul %3, %4, %cst {dimension_numbers = #tpu.dot_dimension_numbers<[1], [0], [0], [1], [0, 0, 1, 1], [], []>} : vector<128x32xbf16>, vector<32x128xbf16>, vector<128x128xf32> -> vector<128x128xf32>
    %c128_i32 = arith.constant 128 : i32
    %6 = arith.muli %arg0, %c128_i32 : i32
    %7 = tpu.iota {dimensions = array<i32: 0>} : vector<128x1xi32>
    %8 = vector.broadcast %6 : i32 to vector<128x1xi32>
    %9 = arith.addi %8, %7 : vector<128x1xi32>
    %c0_4 = arith.constant 0 : index
    %c0_5 = arith.constant 0 : index
    %10 = vector.load %arg6[%c0_4, %c0_5] : memref<1x128xi32, #tpu.memory_space<vmem>>, vector<1x128xi32>
    %11 = vector.broadcast %10 : vector<1x128xi32> to vector<128x128xi32>
    %12 = vector.broadcast %9 : vector<128x1xi32> to vector<128x128xi32>
    %13 = arith.cmpi ne, %11, %12 : vector<128x128xi32>
    %c0_i32_6 = arith.constant 0 : i32
    %14 = vector.broadcast %c0_i32_6 : i32 to vector<1x128xi32>
    %15 = arith.cmpi sge, %10, %14 : vector<1x128xi32>
    %16 = vector.broadcast %15 : vector<1x128xi1> to vector<128x128xi1>
    %17 = arith.andi %13, %16 : vector<128x128xi1>
    %c0_7 = arith.constant 0 : index
    %c0_8 = arith.constant 0 : index
    %18 = vector.load %arg4[%c0_7, %c0_8] : memref<128x1xi32, #tpu.memory_space<vmem>>, vector<128x1xi32>
    %c0_9 = arith.constant 0 : index
    %c0_10 = arith.constant 0 : index
    %19 = vector.load %arg5[%c0_9, %c0_10] : memref<1x128xi32, #tpu.memory_space<vmem>>, vector<1x128xi32>
    %20 = vector.broadcast %18 : vector<128x1xi32> to vector<128x128xi32>
    %21 = vector.broadcast %19 : vector<1x128xi32> to vector<128x128xi32>
    %22 = arith.cmpi eq, %20, %21 : vector<128x128xi32>
    %23 = arith.andi %17, %22 : vector<128x128xi1>
    %cst_11 = arith.constant 14.2857141 : f32
    %24 = vector.broadcast %cst_11 : f32 to vector<128x128xf32>
    %25 = arith.subf %5, %24 : vector<128x128xf32>
    %26 = math.exp %25 : vector<128x128xf32>
    %c0_12 = arith.constant 0 : index
    %c0_13 = arith.constant 0 : index
    %27 = vector.load %arg8[%c0_12, %c0_13] : memref<128x1xf32, #tpu.memory_space<vmem>>, vector<128x1xf32>
    %cst_14 = arith.constant 0.000000e+00 : f32
    %28 = vector.broadcast %cst_14 : f32 to vector<128x128xf32>
    %29 = arith.select %17, %26, %28 : vector<128x128xi1>, vector<128x128xf32>
    %cst_15 = arith.constant dense<0.000000e+00> : vector<128xf32>
    %30 = vector.multi_reduction <add>, %29, %cst_15 [1] : vector<128x128xf32> to vector<128xf32>
    %31 = vector.shape_cast %30 : vector<128xf32> to vector<128x1xf32>
    %32 = arith.addf %27, %31 : vector<128x1xf32>
    %c0_16 = arith.constant 0 : index
    %c0_17 = arith.constant 0 : index
    %33 = vector.load %arg8[%c0_16, %c0_17] : memref<128x1xf32, #tpu.memory_space<vmem>>, vector<128x1xf32>
    tpu.vector_store %arg8[%c0_16, %c0_17], %32 {strides = array<i32>} : memref<128x1xf32, #tpu.memory_space<vmem>>, vector<128x1xf32>,
    %c0_18 = arith.constant 0 : index
    %c0_19 = arith.constant 0 : index
    %34 = vector.load %arg9[%c0_18, %c0_19] : memref<128x1xf32, #tpu.memory_space<vmem>>, vector<128x1xf32>
    %cst_20 = arith.constant 0.000000e+00 : f32
    %35 = vector.broadcast %cst_20 : f32 to vector<128x128xf32>
    %36 = arith.select %23, %5, %35 : vector<128x128xi1>, vector<128x128xf32>
    %cst_21 = arith.constant dense<0.000000e+00> : vector<128xf32>
    %37 = vector.multi_reduction <add>, %36, %cst_21 [1] : vector<128x128xf32> to vector<128xf32>
    %38 = vector.shape_cast %37 : vector<128xf32> to vector<128x1xf32>
    %39 = arith.addf %34, %38 : vector<128x1xf32>
    %c0_22 = arith.constant 0 : index
    %c0_23 = arith.constant 0 : index
    %40 = vector.load %arg9[%c0_22, %c0_23] : memref<128x1xf32, #tpu.memory_space<vmem>>, vector<128x1xf32>
    tpu.vector_store %arg9[%c0_22, %c0_23], %39 {strides = array<i32>} : memref<128x1xf32, #tpu.memory_space<vmem>>, vector<128x1xf32>,
    %c0_24 = arith.constant 0 : index
    %c0_25 = arith.constant 0 : index
    %41 = vector.load %arg10[%c0_24, %c0_25] : memref<128x1xf32, #tpu.memory_space<vmem>>, vector<128x1xf32>
    %42 = arith.extui %23 : vector<128x128xi1> to vector<128x128xi32>
    %43 = arith.sitofp %42 : vector<128x128xi32> to vector<128x128xf32>
    %cst_26 = arith.constant dense<0.000000e+00> : vector<128xf32>
    %44 = vector.multi_reduction <add>, %43, %cst_26 [1] : vector<128x128xf32> to vector<128xf32>
    %45 = vector.shape_cast %44 : vector<128xf32> to vector<128x1xf32>
    %46 = arith.addf %41, %45 : vector<128x1xf32>
    %c0_27 = arith.constant 0 : index
    %c0_28 = arith.constant 0 : index
    %47 = vector.load %arg10[%c0_27, %c0_28] : memref<128x1xf32, #tpu.memory_space<vmem>>, vector<128x1xf32>
    tpu.vector_store %arg10[%c0_27, %c0_28], %46 {strides = array<i32>} : memref<128x1xf32, #tpu.memory_space<vmem>>, vector<128x1xf32>,
    %c0_i32_29 = arith.constant 0 : i32
    %48 = arith.cmpi eq, %arg1, %c0_i32_29 : i32
    %49 = arith.extui %48 : i1 to i32
    %c0_i32_30 = arith.constant 0 : i32
    %50 = arith.cmpi ne, %49, %c0_i32_30 : i32
    scf.if %50 {
      %c0_31 = arith.constant 0 : index
      %c0_32 = arith.constant 0 : index
      %51 = vector.load %arg9[%c0_31, %c0_32] : memref<128x1xf32, #tpu.memory_space<vmem>>, vector<128x1xf32>
      %c0_33 = arith.constant 0 : index
      %c0_34 = arith.constant 0 : index
      %52 = vector.load %arg10[%c0_33, %c0_34] : memref<128x1xf32, #tpu.memory_space<vmem>>, vector<128x1xf32>
      %cst_35 = arith.constant 1.000000e+00 : f32
      %53 = vector.broadcast %cst_35 : f32 to vector<128x1xf32>
      %54 = arith.maximumf %52, %53 : vector<128x1xf32>
      %55 = arith.divf %51, %54 : vector<128x1xf32>
      %cst_36 = arith.constant 14.2857141 : f32
      %56 = vector.broadcast %cst_36 : f32 to vector<128x1xf32>
      %57 = arith.subf %55, %56 : vector<128x1xf32>
      %c0_37 = arith.constant 0 : index
      %c0_38 = arith.constant 0 : index
      %58 = vector.load %arg8[%c0_37, %c0_38] : memref<128x1xf32, #tpu.memory_space<vmem>>, vector<128x1xf32>
      %59 = math.log %58 : vector<128x1xf32>
      %60 = arith.subf %57, %59 : vector<128x1xf32>
      %c128_i32_39 = arith.constant 128 : i32
      %61 = vector.broadcast %c128_i32_39 : i32 to vector<128x1xi32>
      %62 = arith.cmpi slt, %9, %61 : vector<128x1xi32>
      %cst_40 = arith.constant 0.000000e+00 : f32
      %63 = vector.broadcast %cst_40 : f32 to vector<128x1xf32>
      %64 = arith.select %62, %60, %63 : vector<128x1xi1>, vector<128x1xf32>
      %65 = vector.shape_cast %64 : vector<128x1xf32> to vector<1x128x1xf32>
      %cst_41 = arith.constant dense<0.000000e+00> : vector<1xf32>
      %66 = vector.multi_reduction <add>, %65, %cst_41 [1, 2] : vector<1x128x1xf32> to vector<1xf32>
      %67 = vector.shape_cast %66 : vector<1xf32> to vector<1x1x1xf32>
      %68 = vector.extract %67[0, 0, 0] : f32 from vector<1x1x1xf32>
      %69 = vector.broadcast %68 : f32 to vector<8x128xf32>
      %c0_42 = arith.constant 0 : index
      %c0_43 = arith.constant 0 : index
      %c0_44 = arith.constant 0 : index
      %70 = vector.load %arg7[%c0_42, %c0_43, %c0_44] : memref<1x8x128xf32, #tpu.memory_space<vmem>>, vector<1x8x128xf32>
      %71 = vector.shape_cast %70 : vector<1x8x128xf32> to vector<8x128xf32>
      %72 = vector.shape_cast %69 : vector<8x128xf32> to vector<1x8x128xf32>
      tpu.vector_store %arg7[%c0_42, %c0_43, %c0_44], %72 {strides = array<i32>} : memref<1x8x128xf32, #tpu.memory_space<vmem>>, vector<1x8x128xf32>,
    } else {
    }
    return
  }
  func.func @transform_0(%arg0: i32, %arg1: i32) -> (i32, i32) {
    %c0_i32 = arith.constant 0 : i32
    %c0_i32_0 = arith.constant 0 : i32
    return %arg0, %c0_i32 : i32, i32
  }
  func.func @transform_1(%arg0: i32, %arg1: i32) -> (i32, i32) {
    %c0_i32 = arith.constant 0 : i32
    %c0_i32_0 = arith.constant 0 : i32
    return %c0_i32, %arg1 : i32, i32
  }
  func.func @transform_2(%arg0: i32, %arg1: i32) -> (i32, i32) {
    %c0_i32 = arith.constant 0 : i32
    %c0_i32_0 = arith.constant 0 : i32
    return %arg0, %c0_i32 : i32, i32
  }
  func.func @transform_3(%arg0: i32, %arg1: i32) -> (i32, i32) {
    %c0_i32 = arith.constant 0 : i32
    %c0_i32_0 = arith.constant 0 : i32
    return %c0_i32, %arg1 : i32, i32
  }
  func.func @transform_4(%arg0: i32, %arg1: i32) -> (i32, i32) {
    %c0_i32 = arith.constant 0 : i32
    %c0_i32_0 = arith.constant 0 : i32
    return %c0_i32, %arg1 : i32, i32
  }
  func.func @transform_5(%arg0: i32, %arg1: i32) -> (i32, i32, i32) {
    %c0_i32 = arith.constant 0 : i32
    %c0_i32_0 = arith.constant 0 : i32
    %c0_i32_1 = arith.constant 0 : i32
    return %arg0, %c0_i32, %c0_i32_0 : i32, i32, i32
  }
}

</mosaic_0001>

<bundles_post_ra>
// kernel: tpu_custom_call.1
= control target key start
LH: loop header
LB: loop body
LE: loop exit
PB: predicated region body
PF: predicated region fallthrough
CT: control target
= control target key end

     0   :  { %vm147_vm0 = vcmask 261120   ;;  %v1291_v7 = vmov 0   ;;  %s2011_s0 = inlined_call_operand.vmem [shape: bf16[128,32], index: 0, kind: input, shape index: {}]   ;;  %s2012_s1 = inlined_call_operand.vmem [shape: bf16[32,128], index: 1, kind: input, shape index: {}]   ;;  %s2013_s2 = inlined_call_operand.vmem [shape: s32[128,1], index: 2, kind: input, shape index: {}]   ;;  %s2014_s3 = inlined_call_operand.vmem [shape: s32[1,128], index: 3, kind: input, shape index: {}]   ;;  %s2015_s4 = inlined_call_operand.vmem [shape: s32[1,128], index: 4, kind: input, shape index: {}]   ;;  %s2016_s5 = inlined_call_operand.hbm [shape: f32[1,8,128], index: 5, kind: output, shape index: {}]  }
   0x1   :  { %v1161_v0 = vld [vmem:[%s2012_s1] sm:$0xff]   ;;  %v1162_v1 = vld [vmem:[%s2012_s1 + $0x8] sm:$0xff]   ;;  %v1167_v6 = vld [vmem:[%s2011_s0 + $0x10] sm:$0xff]   ;;  %1159 = vset.pattern.permute.xlu0 %v1291_v7  ;;  %1160 = vset.pattern.permute.xlu1 %v1291_v7 }
   0x2   :  { %1130 = vmatprep.subr.bf16.mxu0 %v1161_v0  ;;  %1150 = vmatprep.subr.bf16.mxu1 %v1161_v0  ;;  %v1163_v2 = vld [vmem:[%s2011_s0] sm:$0xff]   ;;  %v1165_v4 = vld [vmem:[%s2011_s0 + $0x8] sm:$0xff]   ;;  %v1168_v8 = vld [vmem:[%s2011_s0 + $0x30] sm:$0xff]  }
   0x3   :  { %1131 = vmatpush3.bf16.msra.mxu0 %v1161_v0  ;;  %1152 = vmatpush3.bf16.msra.mxu1 %v1161_v0  ;;  %v1164_v3 = vld [vmem:[%s2011_s0 + $0x20] sm:$0xff]   ;;  %v1166_v5 = vld [vmem:[%s2011_s0 + $0x28] sm:$0xff]   ;;  %v350_v10 = vld [vmem:[%s2013_s2 + $0x10] sm:$0xff] }
   0x4   :  { %1132 = vmatprep.subr.bf16.mxu0 %v1162_v1  ;;  %1151 = vmatprep.subr.bf16.mxu1 %v1162_v1  ;;  %v348_v9 = vld [vmem:[%s2013_s2] sm:$0xff]  ;;  %v351_v11 = vld [vmem:[%s2013_s2 + $0x18] sm:$0xff]  ;;  %v349_v12 = vld [vmem:[%s2013_s2 + $0x8] sm:$0xff] }
   0x5   :  { %1134 = vmatprep.mubr.msk.bf16.mxu0 %vm147_vm0, %v1163_v2  ;;  %1142 = vmatprep.mubr.msk.bf16.mxu1 %vm147_vm0, %v1164_v3  ;;  %v1169_v13 = vld [vmem:[%s2011_s0 + $0x18] sm:$0xff]   ;;  %v353_v15 = vld [vmem:[%s2013_s2 + $0x28] sm:$0xff]  ;;  %v352_v16 = vld [vmem:[%s2013_s2 + $0x20] sm:$0xff] }
   0x6   :  { %366 = vperm.xlu0 %1159, %v348_v9   ;;  %372 = vperm.xlu1 %1160, %v350_v10   ;;  %v1170_v14 = vld [vmem:[%s2011_s0 + $0x38] sm:$0xff]  }
   0x7   :  { %1133 = vmatpush3.bf16.msra.mxu0 %v1162_v1  ;;  %1153 = vmatpush3.bf16.msra.mxu1 %v1162_v1 }
   0xa   :  { %1135 = vmatmul.mubr.msk.bf16.vlgmr.msra.gmra.mrb[0].mxu0 %vm147_vm0, %v1165_v4  ;;  %1143 = vmatmul.mubr.msk.bf16.vlgmr.msra.gmra.mrb[0].mxu1 %vm147_vm0, %v1166_v5 }
   0xb   :  { %1138 = vmatprep.mubr.msk.bf16.mxu0 %vm147_vm0, %v1167_v6  ;;  %1146 = vmatprep.mubr.msk.bf16.mxu1 %vm147_vm0, %v1168_v8 }
   0xc   :  { %375 = vperm.xlu1 %1160, %v351_v11   ;;  %369 = vperm.xlu0 %1159, %v349_v12  }
   0xd   :  { %10 = vsyncpa [#allocation6], 0  ;;  %v355_v17 = vld [vmem:[%s2013_s2 + $0x38] sm:$0xff]  ;;  %v354_v18 = vld [vmem:[%s2013_s2 + $0x30] sm:$0xff]  ;;  %v270_v27 = vlaneseq  ;;  %v2036_v39 = vmov 0  ;;  %v2038_v42 = vmov 0 }
   0xe   :  { %v357_v19 = vld [vmem:[%s2013_s2 + $0x48] sm:$0xff]  ;;  %v356_v20 = vld [vmem:[%s2013_s2 + $0x40] sm:$0xff]  ;;  %v359_v21 = vld [vmem:[%s2013_s2 + $0x58] sm:$0xff]  ;;  %v2040_v43 = vmov 0  ;;  %v1292_v45 = vmov 0.0   ;;  %v2046_v51 = vmov 0 }
   0xf   :  { %v358_v22 = vld [vmem:[%s2013_s2 + $0x50] sm:$0xff]  ;;  %v361_v23 = vld [vmem:[%s2013_s2 + $0x68] sm:$0xff]  ;;  %v360_v24 = vld [vmem:[%s2013_s2 + $0x60] sm:$0xff]  ;;  %v1413_v29 = vshrl.u32 %v270_v27, 7  ;;  %v2048_v53 = vmov 0  ;;  %v2054_v0 = vmov 0 }
  0x10   :  { %381 = vperm.xlu1 %1160, %v353_v15   ;;  %378 = vperm.xlu0 %1159, %v352_v16   ;;  %v363_v25 = vld [vmem:[%s2013_s2 + $0x78] sm:$0xff]  ;;  %v362_v26 = vld [vmem:[%s2013_s2 + $0x70] sm:$0xff]  ;;  %v304_v28 = vld [vmem:[%s2015_s4] sm:$0x1]  ;;  %v2056_v1 = vmov 0  ;;  %v2058_v4 = vmov 0 }
  0x11   :  { %vm325_vm1 = vcmp.ge.s32.totalorder %v304_v28, 0  ;;  %v307_v30 = vsub.s32 0, %v1413_v29  ;;  %v273_v34 = vadd.s32 16, %v1413_v29  ;;  %v274_v35 = vadd.s32 24, %v1413_v29  ;;  %v1430_v37 = vld [vmem:[%s2014_s3] ss:$0 sm:$0xff] }
  0x12   :  { %1139 = vmatmul.mubr.msk.bf16.gmra.mrb[4].mxu0 %vm147_vm0, %v1169_v13  ;;  %1147 = vmatmul.mubr.msk.bf16.gmra.mrb[4].mxu1 %vm147_vm0, %v1170_v14  ;;  %v326_v31 = vsel %vm325_vm1, 1, %v1291_v7  ;;  %v272_v36 = vadd.s32 8, %v1413_v29  ;;  %v275_v38 = vadd.s32 32, %v1413_v29  ;;  %v276_v50 = vadd.s32 40, %v1413_v29  ;;  %s1293_s3 = smov [#allocation5]  }
  0x13   :  { %v1416_v32 = vrot.slane %v304_v28, %v307_v30  ;;  %v1418_v33 = vrot.slane %v326_v31, %v307_v30  ;;  %v277_v54 = vadd.s32 48, %v1413_v29  ;;  %v280_v56 = vadd.s32 72, %v1413_v29  ;;  %s1045_s19 = sshll.u32 %s1293_s3, 4  ;;  %s1046_s19 = int_to_ptr.vmem [resolvable:$true] %s1045_s19 }
  0x14   :  { %387 = vperm.xlu1 %1160, %v355_v17   ;;  %384 = vperm.xlu0 %1159, %v354_v18   ;;  %v278_v61 = vadd.s32 56, %v1413_v29  ;;  %v282_v63 = vadd.s32 88, %v1413_v29  ;;  %v279_v5 = vadd.s32 64, %v1413_v29  ;;  %v2060_v7 = vmov 0  ;;  %s1267_s21 = scalar_lea.vmem %s1046_s19, 128  ;;  %p1272_p1 = scmp.lt.s32.totalorder %s1046_s19, %s1046_s19 }
  0x15   :  { %vm2023_vm2 = vcmp.eq.s32.totalorder %v1418_v33, 1  ;;  %vm309_vm3 = vcmp.ne.s32.totalorder %v1416_v32, %v1413_v29  ;;  %vm311_vm4 = vcmp.ne.s32.totalorder %v1416_v32, %v273_v34  ;;  %vm312_vm5 = vcmp.ne.s32.totalorder %v1416_v32, %v274_v35  ;;  %p1268_p0 = scmp.ne.s32.totalorder %s1046_s19, %s1267_s21  ;;  %p1273_p2 = scmp.lt.s32.totalorder %s1267_s21, %s1267_s21 }
  0x16   :  { %vm1436_vm6 = vmand %vm309_vm3, %vm2023_vm2  ;;  %vm310_vm11 = vcmp.ne.s32.totalorder %v1416_v32, %v272_v36  ;;  %vm313_vm13 = vcmp.ne.s32.totalorder %v1416_v32, %v275_v38  ;;  %v284_v8 = vadd.s32 104, %v1413_v29  ;;  %v2062_v9 = vmov 0 }
  0x17   :  { %v2037_v39 = vsel %vm1436_vm6, 4294967295, %v2036_v39  ;;  %vm1442_vm7 = vmand %vm311_vm4, %vm2023_vm2  ;;  %v2064_v10 = vmov 0  ;;  %v2066_v13 = vmov 0  ;;  %v281_v14 = vadd.s32 80, %v1413_v29  ;;  %p1274_p3 = por %p1273_p2, %p1272_p1 }
  0x18   :  { %393 = vperm.xlu1 %1160, %v357_v19   ;;  %390 = vperm.xlu0 %1159, %v356_v20   ;;  %v2039_v42 = vsel %vm1442_vm7, 4294967295, %v2038_v42  ;;  %vm1450_vm10 = vmand %vm312_vm5, %vm2023_vm2  ;;  %v2068_v16 = vmov 0  ;;  %v283_v17 = vadd.s32 96, %v1413_v29  ;;  %v2070_v18 = vmov 0 }
  0x19   :  { %v2041_v43 = vsel %vm1450_vm10, 4294967295, %v2040_v43  ;;  %vm1474_vm15 = vmand %vm310_vm11, %vm2023_vm2  ;;  %vm315_vm11 = vcmp.ne.s32.totalorder %v1416_v32, %v277_v54  ;;  %v2073_v20 = vmov 0  ;;  %v286_v27 = vadd.s32 120, %v1413_v29  ;;  %p1275_p4 = pnand %p1274_p3, %p1268_p0 }
  0x1a   :  { %v2047_v51 = vsel %vm1474_vm15, 4294967295, %v2046_v51  ;;  %vm1485_vm3 = vmand %vm313_vm13, %vm2023_vm2  ;;  %v2080_v28 = vmov 0 }
  0x1b   :  { %v2049_v53 = vsel %vm1485_vm3, 4294967295, %v2048_v53 }
  0x1c   :  { %399 = vperm.xlu1 %1160, %v359_v21   ;;  %396 = vperm.xlu0 %1159, %v358_v22  }
  0x20   :  { %405 = vperm.xlu1 %1160, %v361_v23   ;;  %402 = vperm.xlu0 %1159, %v360_v24   ;;  %v2076_v23 = vmov 0  ;;  %v285_v24 = vadd.s32 112, %v1413_v29 }
  0x24   :  { %411 = vperm.xlu1 %1160, %v363_v25   ;;  %408 = vperm.xlu0 %1159, %v362_v26   ;;  %v2078_v26 = vmov 0 }
  0x85   :  { %v367_v40 = vpop.permute.xlu0 %366  ;;  %v373_v41 = vpop.permute.xlu1 %372 }
  0x86   :  { %vm417_vm8 = vcmp.eq.s32.totalorder %v367_v40, %v1430_v37  ;;  %vm419_vm9 = vcmp.eq.s32.totalorder %v373_v41, %v1430_v37 }
  0x87   :  { %vm1457_vm12 = vmand %vm1436_vm6, %vm417_vm8  ;;  %vm314_vm8 = vcmp.ne.s32.totalorder %v1416_v32, %v276_v50 }
  0x88   :  { %v1088_v46 = vsel %vm1457_vm12, 1.0, %v1292_v45  ;;  %vm1467_vm14 = vmand %vm1442_vm7, %vm419_vm9 }
  0x89   :  { %738 = vadd.xlane.f32.xlu0 %v1088_v46  ;;  %v1090_v52 = vsel %vm1467_vm14, 1.0, %v1292_v45 }
  0x8b   :  { %v376_v48 = vpop.permute.xlu1 %375  ;;  %v370_v49 = vpop.permute.xlu0 %369 }
  0x8c   :  { %vm420_vm0 = vcmp.eq.s32.totalorder %v376_v48, %v1430_v37  ;;  %vm418_vm1 = vcmp.eq.s32.totalorder %v370_v49, %v1430_v37 }
  0x8d   :  { %vm1492_vm4 = vmand %vm1450_vm10, %vm420_vm0  ;;  %742 = vadd.xlane.f32.xlu0 %v1090_v52  ;;  %vm318_vm0 = vcmp.ne.s32.totalorder %v1416_v32, %v280_v56 }
  0x8e   :  { %vm1499_vm5 = vmand %vm1474_vm15, %vm418_vm1  ;;  %v1091_v62 = vsel %vm1492_vm4, 1.0, %v1292_v45 }
  0x8f   :  { %v382_v58 = vpop.permute.xlu1 %381  ;;  %v379_v59 = vpop.permute.xlu0 %378  ;;  %v1089_v60 = vsel %vm1499_vm5, 1.0, %v1292_v45  ;;  %vm1524_vm15 = vmand %vm314_vm8, %vm2023_vm2 }
  0x90   :  { %vm421_vm9 = vcmp.eq.s32.totalorder %v379_v59, %v1430_v37  ;;  %740 = vadd.xlane.f32.xlu1 %v1089_v60  ;;  %vm422_vm1 = vcmp.eq.s32.totalorder %v382_v58, %v1430_v37  ;;  %v2057_v1 = vsel %vm1524_vm15, 4294967295, %v2056_v1  ;;  %vm1530_vm10 = vmand %vm315_vm11, %vm2023_vm2 }
  0x91   :  { %vm1516_vm13 = vmand %vm1485_vm3, %vm421_vm9  ;;  %744 = vadd.xlane.f32.xlu0 %v1091_v62  ;;  %v2059_v4 = vsel %vm1530_vm10, 4294967295, %v2058_v4  ;;  %vm316_vm9 = vcmp.ne.s32.totalorder %v1416_v32, %v278_v61  ;;  %vm320_vm3 = vcmp.ne.s32.totalorder %v1416_v32, %v282_v63 }
  0x92   :  { %v2055_v0 = vsel %vm1516_vm13, 4294967295, %v2054_v0  ;;  %v1092_v6 = vsel %vm1516_vm13, 1.0, %v1292_v45  ;;  %vm1541_vm8 = vmand %vm318_vm0, %vm2023_vm2 }
  0x93   :  { %v388_v2 = vpop.permute.xlu1 %387  ;;  %v385_v3 = vpop.permute.xlu0 %384  ;;  %v2061_v7 = vsel %vm1541_vm8, 4294967295, %v2060_v7  ;;  %vm1550_vm6 = vmand %vm1524_vm15, %vm422_vm1  ;;  %vm317_vm1 = vcmp.ne.s32.totalorder %v1416_v32, %v279_v5 }
  0x94   :  { %vm423_vm11 = vcmp.eq.s32.totalorder %v385_v3, %v1430_v37  ;;  %v2063_v9 = vsel %vm1550_vm6, 4294967295, %v2062_v9  ;;  %vm1556_vm7 = vmand %vm316_vm9, %vm2023_vm2  ;;  %v1093_v15 = vsel %vm1550_vm6, 1.0, %v1292_v45 }
  0x95   :  { %v2065_v10 = vsel %vm1556_vm7, 4294967295, %v2064_v10  ;;  %746 = vadd.xlane.f32.xlu0 %v1092_v6  ;;  %vm1562_vm0 = vmand %vm320_vm3, %vm2023_vm2  ;;  %vm322_vm3 = vcmp.ne.s32.totalorder %v1416_v32, %v284_v8  ;;  %vm424_vm2 = vcmp.eq.s32.totalorder %v388_v2, %v1430_v37 }
  0x96   :  { %v2067_v13 = vsel %vm1562_vm0, 4294967295, %v2066_v13  ;;  %vm1574_vm9 = vmand %vm1530_vm10, %vm423_vm11  ;;  %vm2072_vm11 = vcmp.eq.s32.totalorder %v1418_v33, 1 }
  0x97   :  { %v394_v11 = vpop.permute.xlu1 %393  ;;  %v391_v12 = vpop.permute.xlu0 %390  ;;  %v2069_v16 = vsel %vm1574_vm9, 4294967295, %v2068_v16  ;;  %vm1592_vm10 = vmand %vm317_vm1, %vm2072_vm11  ;;  %v1094_v25 = vsel %vm1574_vm9, 1.0, %v1292_v45  ;;  %vm323_vm9 = vcmp.ne.s32.totalorder %v1416_v32, %v285_v24 }
  0x98   :  { %vm426_vm15 = vcmp.eq.s32.totalorder %v394_v11, %v1430_v37  ;;  %v2074_v20 = vsel %vm1592_vm10, 4294967295, %v2073_v20  ;;  %vm2075_vm6 = vmmov %vm2072_vm11 }
  0x99   :  { %vm1583_vm13 = vmand %vm1541_vm8, %vm426_vm15  ;;  %748 = vadd.xlane.f32.xlu0 %v1093_v15  ;;  %vm319_vm8 = vcmp.ne.s32.totalorder %v1416_v32, %v281_v14 }
  0x9a   :  { %v2071_v18 = vsel %vm1583_vm13, 4294967295, %v2070_v18  ;;  %v1097_v19 = vsel %vm1583_vm13, 1.0, %v1292_v45  ;;  %vm1598_vm15 = vmand %vm322_vm3, %vm2075_vm6  ;;  %vm321_vm6 = vcmp.ne.s32.totalorder %v1416_v32, %v283_v17  ;;  %vm425_vm3 = vcmp.eq.s32.totalorder %v391_v12, %v1430_v37 }
  0x9b   :  { %v400_v21 = vpop.permute.xlu1 %399  ;;  %756 = vadd.xlane.f32.xlu1 %v1097_v19  ;;  %v397_v22 = vpop.permute.xlu0 %396  ;;  %v2077_v23 = vsel %vm1598_vm15, 4294967295, %v2076_v23  ;;  %vm1610_vm1 = vmand %vm1556_vm7, %vm424_vm2  ;;  %vm2082_vm2 = vcmp.eq.s32.totalorder %v1418_v33, 1 }
  0x9c   :  { %vm428_vm13 = vcmp.eq.s32.totalorder %v400_v21, %v1430_v37  ;;  %v2079_v26 = vsel %vm1610_vm1, 4294967295, %v2078_v26  ;;  %vm1628_vm7 = vmand %vm319_vm8, %vm2082_vm2  ;;  %v1095_v36 = vsel %vm1610_vm1, 1.0, %v1292_v45  ;;  %vm2092_vm1 = vcmp.eq.s32.totalorder %v1418_v33, 1 }
  0x9d   :  { %vm1619_vm11 = vmand %vm1562_vm0, %vm428_vm13  ;;  %750 = vadd.xlane.f32.xlu0 %v1094_v25 }
  0x9e   :  { %v2081_v28 = vsel %vm1619_vm11, 4294967295, %v2080_v28  ;;  %v1099_v30 = vsel %vm1619_vm11, 1.0, %v1292_v45  ;;  %vm2085_vm13 = vmmov %vm2082_vm2  ;;  %vm324_vm2 = vcmp.ne.s32.totalorder %v1416_v32, %v286_v27 }
  0x9f   :  { %v406_v29 = vpop.permute.xlu1 %405  ;;  %760 = vadd.xlane.f32.xlu1 %v1099_v30  ;;  %v1632_v34 = vpop.permute.xlu0 %402  ;;  %vm1636_vm0 = vmand %vm321_vm6, %vm2085_vm13  ;;  %vm427_vm6 = vcmp.eq.s32.totalorder %v397_v22, %v1430_v37 }
  0xa0   :  { %vm430_vm11 = vcmp.eq.s32.totalorder %v406_v29, %v1430_v37  ;;  %vm1647_vm8 = vmand %vm1592_vm10, %vm425_vm3 }
  0xa1   :  { %vm1655_vm13 = vmand %vm1598_vm15, %vm430_vm11  ;;  %752 = vadd.xlane.f32.xlu0 %v1095_v36  ;;  %v1096_v50 = vsel %vm1647_vm8, 1.0, %v1292_v45 }
  0xa2   :  { %v1101_v41 = vsel %vm1655_vm13, 1.0, %v1292_v45  ;;  %vm1664_vm3 = vmand %vm323_vm9, %vm2092_vm1 }
  0xa3   :  { %v412_v32 = vpop.permute.xlu1 %411  ;;  %764 = vadd.xlane.f32.xlu1 %v1101_v41  ;;  %v409_v48 = vpop.permute.xlu0 %408  ;;  %vm2095_vm10 = vmmov %vm2092_vm1 }
  0xa4   :  { %vm1670_vm11 = vmand %vm324_vm2, %vm2095_vm10  ;;  %vm432_vm15 = vcmp.eq.s32.totalorder %v412_v32, %v1430_v37  ;;  %vm431_vm9 = vcmp.eq.s32.totalorder %v409_v48, %v1430_v37  ;;  %vm429_vm2 = vcmp.eq.s32.totalorder %v1632_v34, %v1430_v37 }
  0xa5   :  { %vm1681_vm1 = vmand %vm1628_vm7, %vm427_vm6  ;;  %754 = vadd.xlane.f32.xlu0 %v1096_v50 }
  0xa6   :  { %vm1687_vm10 = vmand %vm1664_vm3, %vm431_vm9  ;;  %vm26_vm9 = vcmask 7168   ;;  %v1098_v59 = vsel %vm1681_vm1, 1.0, %v1292_v45 }
  0xa7   :  { %v1696_v54 = vsel %vm1687_vm10, 1.0, %v1292_v45  ;;  %vm1700_vm6 = vmand %vm1670_vm11, %vm432_vm15  ;;  %59 = vst.msk [vmem:[#allocation4] sm:$0xff] %vm26_vm9, %v1292_v45 }
  0xa8   :  { %v1707_v58 = vsel %vm1700_vm6, 1.0, %v1292_v45  ;;  %27 = vst.msk [vmem:[#allocation2] sm:$0xff] %vm26_vm9, %v1292_v45  ;;  %28 = vst.msk [vmem:[#allocation2 + $0x8] sm:$0xff] %vm26_vm9, %v1292_v45 }
  0xa9   :  { %29 = vst.msk [vmem:[#allocation2 + $0x10] sm:$0xff] %vm26_vm9, %v1292_v45  ;;  %30 = vst.msk [vmem:[#allocation2 + $0x18] sm:$0xff] %vm26_vm9, %v1292_v45  ;;  %758 = vadd.xlane.f32.xlu0 %v1098_v59 }
  0xaa   :  { %31 = vst.msk [vmem:[#allocation2 + $0x20] sm:$0xff] %vm26_vm9, %v1292_v45  ;;  %32 = vst.msk [vmem:[#allocation2 + $0x28] sm:$0xff] %vm26_vm9, %v1292_v45 }
  0xab   :  { %33 = vst.msk [vmem:[#allocation2 + $0x30] sm:$0xff] %vm26_vm9, %v1292_v45  ;;  %34 = vst.msk [vmem:[#allocation2 + $0x38] sm:$0xff] %vm26_vm9, %v1292_v45 }
  0xac   :  { %35 = vst.msk [vmem:[#allocation2 + $0x40] sm:$0xff] %vm26_vm9, %v1292_v45  ;;  %36 = vst.msk [vmem:[#allocation2 + $0x48] sm:$0xff] %vm26_vm9, %v1292_v45 }
  0xad   :  { %37 = vst.msk [vmem:[#allocation2 + $0x50] sm:$0xff] %vm26_vm9, %v1292_v45  ;;  %38 = vst.msk [vmem:[#allocation2 + $0x58] sm:$0xff] %vm26_vm9, %v1292_v45 }
  0xae   :  { %39 = vst.msk [vmem:[#allocation2 + $0x60] sm:$0xff] %vm26_vm9, %v1292_v45  ;;  %40 = vst.msk [vmem:[#allocation2 + $0x68] sm:$0xff] %vm26_vm9, %v1292_v45 }
  0xaf   :  { %41 = vst.msk [vmem:[#allocation2 + $0x70] sm:$0xff] %vm26_vm9, %v1292_v45  ;;  %42 = vst.msk [vmem:[#allocation2 + $0x78] sm:$0xff] %vm26_vm9, %v1292_v45 }
  0xb0   :  { %43 = vst.msk [vmem:[#allocation3] sm:$0xff] %vm26_vm9, %v1292_v45  ;;  %44 = vst.msk [vmem:[#allocation3 + $0x8] sm:$0xff] %vm26_vm9, %v1292_v45 }
  0xb1   :  { %45 = vst.msk [vmem:[#allocation3 + $0x10] sm:$0xff] %vm26_vm9, %v1292_v45  ;;  %46 = vst.msk [vmem:[#allocation3 + $0x18] sm:$0xff] %vm26_vm9, %v1292_v45 }
  0xb2   :  { %47 = vst.msk [vmem:[#allocation3 + $0x20] sm:$0xff] %vm26_vm9, %v1292_v45  ;;  %48 = vst.msk [vmem:[#allocation3 + $0x28] sm:$0xff] %vm26_vm9, %v1292_v45 }
  0xb3   :  { %49 = vst.msk [vmem:[#allocation3 + $0x30] sm:$0xff] %vm26_vm9, %v1292_v45  ;;  %50 = vst.msk [vmem:[#allocation3 + $0x38] sm:$0xff] %vm26_vm9, %v1292_v45 }
  0xb4   :  { %51 = vst.msk [vmem:[#allocation3 + $0x40] sm:$0xff] %vm26_vm9, %v1292_v45  ;;  %52 = vst.msk [vmem:[#allocation3 + $0x48] sm:$0xff] %vm26_vm9, %v1292_v45 }
  0xb5   :  { %53 = vst.msk [vmem:[#allocation3 + $0x50] sm:$0xff] %vm26_vm9, %v1292_v45  ;;  %54 = vst.msk [vmem:[#allocation3 + $0x58] sm:$0xff] %vm26_vm9, %v1292_v45 }
  0xb6   :  { %55 = vst.msk [vmem:[#allocation3 + $0x60] sm:$0xff] %vm26_vm9, %v1292_v45  ;;  %56 = vst.msk [vmem:[#allocation3 + $0x68] sm:$0xff] %vm26_vm9, %v1292_v45 }
  0xb7   :  { %57 = vst.msk [vmem:[#allocation3 + $0x70] sm:$0xff] %vm26_vm9, %v1292_v45  ;;  %58 = vst.msk [vmem:[#allocation3 + $0x78] sm:$0xff] %vm26_vm9, %v1292_v45 }
  0xb8   :  { %60 = vst.msk [vmem:[#allocation4 + $0x8] sm:$0xff] %vm26_vm9, %v1292_v45  ;;  %61 = vst.msk [vmem:[#allocation4 + $0x10] sm:$0xff] %vm26_vm9, %v1292_v45 }
  0xb9   :  { %62 = vst.msk [vmem:[#allocation4 + $0x18] sm:$0xff] %vm26_vm9, %v1292_v45  ;;  %63 = vst.msk [vmem:[#allocation4 + $0x20] sm:$0xff] %vm26_vm9, %v1292_v45 }
  0xba   :  { %64 = vst.msk [vmem:[#allocation4 + $0x28] sm:$0xff] %vm26_vm9, %v1292_v45  ;;  %65 = vst.msk [vmem:[#allocation4 + $0x30] sm:$0xff] %vm26_vm9, %v1292_v45 }
  0xbb   :  { %66 = vst.msk [vmem:[#allocation4 + $0x38] sm:$0xff] %vm26_vm9, %v1292_v45  ;;  %67 = vst.msk [vmem:[#allocation4 + $0x40] sm:$0xff] %vm26_vm9, %v1292_v45 }
  0xbc   :  { %68 = vst.msk [vmem:[#allocation4 + $0x48] sm:$0xff] %vm26_vm9, %v1292_v45  ;;  %69 = vst.msk [vmem:[#allocation4 + $0x50] sm:$0xff] %vm26_vm9, %v1292_v45 }
  0xbd   :  { %70 = vst.msk [vmem:[#allocation4 + $0x58] sm:$0xff] %vm26_vm9, %v1292_v45  ;;  %71 = vst.msk [vmem:[#allocation4 + $0x60] sm:$0xff] %vm26_vm9, %v1292_v45 }
  0xbe   :  { %72 = vst.msk [vmem:[#allocation4 + $0x68] sm:$0xff] %vm26_vm9, %v1292_v45  ;;  %73 = vst.msk [vmem:[#allocation4 + $0x70] sm:$0xff] %vm26_vm9, %v1292_v45 }
  0xbf   :  { %74 = vst.msk [vmem:[#allocation4 + $0x78] sm:$0xff] %vm26_vm9, %v1292_v45  ;;  %vm1813_vm15 = vmand %vm1636_vm0, %vm429_vm2  ;;  %vm2110_vm2 = vnez %v2039_v42  ;;  %v691_v38 = vld [vmem:[#allocation4 + $0x8] sm:$0xff] }
  0xc0   :  { %v1100_v61 = vsel %vm1813_vm15, 1.0, %v1292_v45 }
  0xc1   :  { %762 = vadd.xlane.f32.xlu0 %v1100_v61 }
  0xc2   :  { %v697_v33 = vld [vmem:[#allocation4 + $0x38] sm:$0xff] }
  0xdd   :  { %v1136_v62 = vpop.f32.mrb[0].mxu0  ;;  %v1820_v63 = vpop.f32.mrb[0].mxu1 }
  0xde   :  { %v1074_v2 = vadd.f32 -14.285714, %v1136_v62  ;;  %v206_v3 = vpop.f32.mrb[1].mxu0  ;;  %v1822_v5 = vpop.f32.mrb[1].mxu1  ;;  %v1082_v37 = vadd.f32 -14.285714, %v1820_v63 }
  0xdf   :  { %v1072_v6 = vadd.f32 -14.285714, %v206_v3  ;;  %v1137_v8 = vpop.f32.mrb[2].mxu0  ;;  %v1825_v11 = vpop.f32.mrb[2].mxu1  ;;  %v612_v45 = vsel %vm1467_vm14, %v1136_v62, 0.0  ;;  %v610_v47 = vsel %vm1457_vm12, %v206_v3, 0.0  ;;  %vm2106_vm12 = vnez %v2069_v16 }
  0xe0   :  { %v469_v12 = vmul.f32 1.442695, %v1074_v2  ;;  %v1083_v15 = vadd.f32 -14.285714, %v1825_v11  ;;  %v209_v17 = vpop.f32.mrb[3].mxu0  ;;  %v1830_v19 = vpop.f32.mrb[3].mxu1  ;;  %630 = vadd.xlane.f32.xlu1 %v612_v45  ;;  %vm2107_vm14 = vnez %v2079_v26 }
  0xe1   :  { %v465_v14 = vmul.f32 1.442695, %v1072_v6  ;;  %v613_v21 = vsel %vm1492_vm4, %v1137_v8, 0.0  ;;  %v485_v22 = vmul.f32 1.442695, %v1082_v37  ;;  %v611_v55 = vsel %vm1499_vm5, %v209_v17, 0.0 }
  0xe2   :  { %1171 = vpow2.f32 %v469_v12  ;;  %632 = vadd.xlane.f32.xlu0 %v613_v21  ;;  %v1080_v24 = vadd.f32 -14.285714, %v1822_v5  ;;  %v487_v25 = vmul.f32 1.442695, %v1083_v15  ;;  %v1081_v27 = vadd.f32 -14.285714, %v1830_v19 }
  0xe3   :  { %1173 = vpow2.f32 %v465_v14  ;;  %v1075_v59 = vadd.f32 -14.285714, %v1137_v8  ;;  %v1073_v15 = vadd.f32 -14.285714, %v209_v17  ;;  %vm2108_vm4 = vnez %v2055_v0 }
  0xe4   :  { %1175 = vpow2.f32 %v485_v22  ;;  %626 = vadd.xlane.f32.xlu1 %v610_v47  ;;  %v481_v50 = vmul.f32 1.442695, %v1080_v24  ;;  %v483_v44 = vmul.f32 1.442695, %v1081_v27  ;;  %vm2109_vm5 = vnez %v2063_v9 }
  0xe5   :  { %v1140_v30 = vpop.f32.mrb[4].mxu0  ;;  %v1836_v29 = vpop.f32.mrb[4].mxu1  ;;  %1177 = vpow2.f32 %v487_v25  ;;  %v471_v8 = vmul.f32 1.442695, %v1075_v59  ;;  %v467_v25 = vmul.f32 1.442695, %v1073_v15 }
  0xe6   :  { %v1086_v34 = vadd.f32 -14.285714, %v1836_v29  ;;  %v222_v36 = vpop.f32.mrb[5].mxu0  ;;  %v1843_v41 = vpop.f32.mrb[5].mxu1  ;;  %628 = vadd.xlane.f32.xlu0 %v611_v55  ;;  %v616_v57 = vsel %vm2106_vm12, %v1140_v30, 0.0  ;;  %v624_v0 = vsel %vm1687_vm10, %v1836_v29, 0.0  ;;  %vm2111_vm12 = vnez %v2037_v39 }
  0xe7   :  { %v1141_v32 = vpop.f32.mrb[6].mxu0  ;;  %v1845_v48 = vpop.f32.mrb[6].mxu1  ;;  %v614_v16 = vsel %vm2108_vm4, %v222_v36, 0.0  ;;  %v1078_v9 = vadd.f32 -14.285714, %v1140_v30  ;;  %vm2114_vm4 = vnez %v2061_v7 }
  0xe8   :  { %v493_v61 = vmul.f32 1.442695, %v1086_v34  ;;  %v1079_v62 = vadd.f32 -14.285714, %v1141_v32  ;;  %v1087_v2 = vadd.f32 -14.285714, %v1845_v48  ;;  %638 = vadd.xlane.f32.xlu1 %v616_v57 }
  0xe9   :  { %v225_v3 = vpop.f32.mrb[7].mxu0  ;;  %v1850_v37 = vpop.f32.mrb[7].mxu1  ;;  %v617_v6 = vsel %vm2107_vm14, %v1141_v32, 0.0  ;;  %v625_v26 = vsel %vm1700_vm6, %v1845_v48, 0.0  ;;  %v477_v32 = vmul.f32 1.442695, %v1078_v9  ;;  %vm2112_vm14 = vnez %v2067_v13 }
  0xea   :  { %1179 = vpow2.f32 %v493_v61  ;;  %v495_v12 = vmul.f32 1.442695, %v1087_v2  ;;  %640 = vadd.xlane.f32.xlu0 %v617_v6  ;;  %v479_v45 = vmul.f32 1.442695, %v1079_v62  ;;  %v615_v21 = vsel %vm2109_vm5, %v225_v3, 0.0  ;;  %v695_v9 = vld [vmem:[#allocation4 + $0x28] sm:$0xff] }
  0xeb   :  { %1181 = vpow2.f32 %v481_v50  ;;  %v1085_v34 = vadd.f32 -14.285714, %v1850_v37  ;;  %v1076_v50 = vadd.f32 -14.285714, %v222_v36  ;;  %v1077_v2 = vadd.f32 -14.285714, %v225_v3 }
  0xec   :  { %v1172_v14 = vpop.eup %1171  ;;  %1183 = vpow2.f32 %v483_v44  ;;  %634 = vadd.xlane.f32.xlu1 %v614_v16  ;;  %vm2116_vm5 = vnez %v2065_v10  ;;  %v623_v52 = vsel %vm1655_vm13, %v1850_v37, 0.0  ;;  %v693_v37 = vld [vmem:[#allocation4 + $0x18] sm:$0xff]  ;;  %v622_v48 = vsel %vm1813_vm15, %v1843_v41, 0.0 }
  0xed   :  { %v1174_v22 = vpop.eup %1173  ;;  %1185 = vpow2.f32 %v495_v12  ;;  %v515_v17 = vsel %vm2110_vm2, %v1172_v14, 0.0  ;;  %v491_v44 = vmul.f32 1.442695, %v1085_v34  ;;  %v473_v31 = vmul.f32 1.442695, %v1076_v50 }
  0xee   :  { %636 = vadd.xlane.f32.xlu0 %v615_v21  ;;  %1187 = vpow2.f32 %v471_v8  ;;  %v1176_v24 = vpop.eup %1175  ;;  %v513_v27 = vsel %vm2111_vm12, %v1174_v22, 0.0  ;;  %v1084_v12 = vadd.f32 -14.285714, %v1843_v41  ;;  %v475_v8 = vmul.f32 1.442695, %v1077_v2  ;;  %v696_v41 = vld [vmem:[#allocation4 + $0x30] sm:$0xff] }
  0xef   :  { %1189 = vpow2.f32 %v479_v45  ;;  %v1178_v47 = vpop.eup %1177  ;;  %v523_v42 = vsel %vm1628_vm7, %v1176_v24, 0.0  ;;  %vm2113_vm7 = vnez %v2074_v20  ;;  %vm2118_vm2 = vnez %v2059_v4 }
  0xf0   :  { %533 = vadd.xlane.f32.xlu1 %v515_v17  ;;  %1191 = vpow2.f32 %v467_v25  ;;  %v524_v30 = vsel %vm2112_vm14, %v1178_v47, 0.0  ;;  %v489_v14 = vmul.f32 1.442695, %v1084_v12  ;;  %vm2119_vm12 = vnez %v2071_v18 }
  0xf1   :  { %1193 = vpow2.f32 %v477_v32  ;;  %v619_v10 = vsel %vm2119_vm12, %v1830_v19, 0.0  ;;  %vm2120_vm14 = vnez %v2077_v23  ;;  %v620_v18 = vsel %vm1681_vm1, %v1820_v63, 0.0  ;;  %v690_v63 = vld [vmem:[#allocation4] sm:$0xff] }
  0xf2   :  { %529 = vadd.xlane.f32.xlu0 %v513_v27  ;;  %1195 = vpow2.f32 %v491_v44  ;;  %v699_v27 = vld [vmem:[#allocation4 + $0x48] sm:$0xff] }
  0xf3   :  { %1197 = vpow2.f32 %v473_v31 }
  0xf4   :  { %v1871_v55 = vpop.eup %1179  ;;  %549 = vadd.xlane.f32.xlu1 %v523_v42  ;;  %1199 = vpow2.f32 %v475_v8  ;;  %v596_v8 = vld [vmem:[#allocation3 + $0x10] sm:$0xff] }
  0xf5   :  { %v1182_v59 = vpop.eup %1181  ;;  %v527_v39 = vsel %vm1664_vm3, %v1871_v55, 0.0  ;;  %vm2115_vm3 = vnez %v2041_v43  ;;  %1201 = vpow2.f32 %v489_v14  ;;  %v701_v55 = vld [vmem:[#allocation4 + $0x58] sm:$0xff] }
  0xf6   :  { %v1184_v61 = vpop.eup %1183  ;;  %551 = vadd.xlane.f32.xlu0 %v524_v30  ;;  %v521_v36 = vsel %vm2113_vm7, %v1182_v59, 0.0  ;;  %vm2121_vm7 = vnez %v2049_v53 }
  0xf7   :  { %v1878_v62 = vpop.eup %1185  ;;  %v522_v13 = vsel %vm2114_vm4, %v1184_v61, 0.0  ;;  %vm2122_vm4 = vnez %v2057_v1  ;;  %v618_v1 = vsel %vm1647_vm8, %v1822_v5, 0.0 }
  0xf8   :  { %v1188_v57 = vpop.eup %1187  ;;  %v528_v46 = vsel %vm1670_vm11, %v1878_v62, 0.0  ;;  %545 = vadd.xlane.f32.xlu1 %v521_v36  ;;  %vm2117_vm11 = vnez %v2047_v51  ;;  %v698_v62 = vld [vmem:[#allocation4 + $0x40] sm:$0xff] }
  0xf9   :  { %v1190_v6 = vpop.eup %1189  ;;  %v516_v3 = vsel %vm2115_vm3, %v1188_v57, 0.0  ;;  %vm2123_vm3 = vnez %v2081_v28  ;;  %v700_v57 = vld [vmem:[#allocation4 + $0x50] sm:$0xff] }
  0xfa   :  { %547 = vadd.xlane.f32.xlu0 %v522_v13  ;;  %v520_v20 = vsel %vm2116_vm5, %v1190_v6, 0.0  ;;  %v1192_v7 = vpop.eup %1191  ;;  %v621_v53 = vsel %vm2123_vm3, %v1825_v11, 0.0  ;;  %v692_v11 = vld [vmem:[#allocation4 + $0x10] sm:$0xff] }
  0xfb   :  { %v514_v49 = vsel %vm2117_vm11, %v1192_v7, 0.0  ;;  %v1194_v15 = vpop.eup %1193 }
  0xfc   :  { %535 = vadd.xlane.f32.xlu1 %v516_v3  ;;  %v1196_v45 = vpop.eup %1195  ;;  %v519_v43 = vsel %vm2118_vm2, %v1194_v15, 0.0  ;;  %v597_v3 = vld [vmem:[#allocation3 + $0x18] sm:$0xff]  ;;  %v594_v15 = vld [vmem:[#allocation3] sm:$0xff] }
  0xfd   :  { %v1198_v16 = vpop.eup %1197  ;;  %v526_v51 = vsel %vm2120_vm14, %v1196_v45, 0.0  ;;  %v595_v45 = vld [vmem:[#allocation3 + $0x8] sm:$0xff] }
  0xfe   :  { %543 = vadd.xlane.f32.xlu0 %v520_v20  ;;  %v517_v21 = vsel %vm2121_vm7, %v1198_v16, 0.0  ;;  %v1200_v22 = vpop.eup %1199 }
  0xff   :  { %v518_v4 = vsel %vm2122_vm4, %v1200_v22, 0.0  ;;  %v601_v22 = vld [vmem:[#allocation3 + $0x38] sm:$0xff] }
 0x100   :  { %531 = vadd.xlane.f32.xlu1 %v514_v49 }
 0x102   :  { %766 = vadd.xlane.f32.xlu0 %v1696_v54  ;;  %v1202_v54 = vpop.eup %1201 }
 0x103   :  { %v525_v23 = vsel %vm1636_vm0, %v1202_v54, 0.0 }
 0x104   :  { %541 = vadd.xlane.f32.xlu1 %v519_v43 }
 0x106   :  { %644 = vadd.xlane.f32.xlu0 %v619_v10 }
 0x108   :  { %537 = vadd.xlane.f32.xlu1 %v517_v21  ;;  %v600_v21 = vld [vmem:[#allocation3 + $0x30] sm:$0xff] }
 0x10a   :  { %555 = vadd.xlane.f32.xlu0 %v526_v51 }
 0x10c   :  { %539 = vadd.xlane.f32.xlu1 %v518_v4 }
 0x10e   :  { %646 = vadd.xlane.f32.xlu0 %v620_v18 }
 0x110   :  { %553 = vadd.xlane.f32.xlu1 %v525_v23 }
 0x112   :  { %648 = vadd.xlane.f32.xlu0 %v621_v53  ;;  %v598_v53 = vld [vmem:[#allocation3 + $0x20] sm:$0xff] }
 0x114   :  { %642 = vadd.xlane.f32.xlu1 %v618_v1  ;;  %v599_v1 = vld [vmem:[#allocation3 + $0x28] sm:$0xff] }
 0x116   :  { %652 = vadd.xlane.f32.xlu0 %v623_v52  ;;  %v739_v28 = vpop.xlane.xlu0 %738 }
 0x117   :  { %v770_v35 = vadd.f32 %v739_v28, %v690_v63 }
 0x118   :  { %768 = vadd.xlane.f32.xlu1 %v1707_v58 }
 0x119   :  { %786 = vst.msk [vmem:[#allocation4] sm:$0xff] %vm26_vm9, %v770_v35 }
 0x11a   :  { %656 = vadd.xlane.f32.xlu0 %v625_v26  ;;  %v743_v5 = vpop.xlane.xlu0 %742  ;;  %v694_v26 = vld [vmem:[#allocation4 + $0x20] sm:$0xff] }
 0x11b   :  { %v772_v40 = vadd.f32 %v743_v5, %v692_v11  ;;  %v499_v11 = vld [vmem:[#allocation2 + $0x10] sm:$0xff] }
 0x11c   :  { %557 = vadd.xlane.f32.xlu1 %v527_v39  ;;  %v703_v39 = vld [vmem:[#allocation4 + $0x68] sm:$0xff] }
 0x11d   :  { %v741_v19 = vpop.xlane.xlu1 %740  ;;  %788 = vst.msk [vmem:[#allocation4 + $0x10] sm:$0xff] %vm26_vm9, %v772_v40 }
 0x11e   :  { %v771_v17 = vadd.f32 %v741_v19, %v691_v38  ;;  %v745_v58 = vpop.xlane.xlu0 %744  ;;  %v497_v38 = vld [vmem:[#allocation2] sm:$0xff] }
 0x11f   :  { %v773_v56 = vadd.f32 %v745_v58, %v693_v37  ;;  %v508_v58 = vld [vmem:[#allocation2 + $0x58] sm:$0xff] }
 0x120   :  { %559 = vadd.xlane.f32.xlu1 %v528_v46  ;;  %787 = vst.msk [vmem:[#allocation4 + $0x8] sm:$0xff] %vm26_vm9, %v771_v17  ;;  %v702_v46 = vld [vmem:[#allocation4 + $0x60] sm:$0xff]  ;;  %v507_v17 = vld [vmem:[#allocation2 + $0x50] sm:$0xff] }
 0x121   :  { %789 = vst.msk [vmem:[#allocation4 + $0x18] sm:$0xff] %vm26_vm9, %v773_v56 }
 0x122   :  { %v747_v24 = vpop.xlane.xlu0 %746 }
 0x123   :  { %v774_v25 = vadd.f32 %v747_v24, %v694_v26 }
 0x124   :  { %650 = vadd.xlane.f32.xlu1 %v622_v48 }
 0x125   :  { %790 = vst.msk [vmem:[#allocation4 + $0x20] sm:$0xff] %vm26_vm9, %v774_v25  ;;  %v505_v25 = vld [vmem:[#allocation2 + $0x40] sm:$0xff] }
 0x126   :  { %v749_v47 = vpop.xlane.xlu0 %748 }
 0x127   :  { %v775_v42 = vadd.f32 %v749_v47, %v695_v9  ;;  %v506_v9 = vld [vmem:[#allocation2 + $0x48] sm:$0xff] }
 0x128   :  { %654 = vadd.xlane.f32.xlu1 %v624_v0  ;;  %v757_v34 = vpop.xlane.xlu1 %756 }
 0x129   :  { %v779_v60 = vadd.f32 %v757_v34, %v699_v27  ;;  %791 = vst.msk [vmem:[#allocation4 + $0x28] sm:$0xff] %vm26_vm9, %v775_v42 }
 0x12a   :  { %v751_v32 = vpop.xlane.xlu0 %750 }
 0x12b   :  { %795 = vst.msk [vmem:[#allocation4 + $0x48] sm:$0xff] %vm26_vm9, %v779_v60  ;;  %v776_v59 = vadd.f32 %v751_v32, %v696_v41  ;;  %v500_v60 = vld [vmem:[#allocation2 + $0x18] sm:$0xff] }
 0x12c   :  { %v761_v50 = vpop.xlane.xlu1 %760  ;;  %v504_v41 = vld [vmem:[#allocation2 + $0x38] sm:$0xff] }
 0x12d   :  { %v781_v30 = vadd.f32 %v761_v50, %v701_v55  ;;  %792 = vst.msk [vmem:[#allocation4 + $0x30] sm:$0xff] %vm26_vm9, %v776_v59  ;;  %v821_v50 = vld [vmem:[#allocation4] sm:$0xff] }
 0x12e   :  { %v753_v29 = vpop.xlane.xlu0 %752 }
 0x12f   :  { %797 = vst.msk [vmem:[#allocation4 + $0x58] sm:$0xff] %vm26_vm9, %v781_v30  ;;  %v777_v61 = vadd.f32 %v753_v29, %v697_v33  ;;  %v498_v33 = vld [vmem:[#allocation2 + $0x8] sm:$0xff] }
 0x130   :  { %v765_v0 = vpop.xlane.xlu1 %764  ;;  %v822_v29 = vld [vmem:[#allocation4 + $0x8] sm:$0xff] }
 0x131   :  { %v783_v44 = vadd.f32 %v765_v0, %v703_v39  ;;  %793 = vst.msk [vmem:[#allocation4 + $0x38] sm:$0xff] %vm26_vm9, %v777_v61  ;;  %v704_v39 = vld [vmem:[#allocation4 + $0x70] sm:$0xff]  ;;  %v837_v0 = vmax.f32 %v821_v50, 1.0 }
 0x132   :  { %v755_v31 = vpop.xlane.xlu0 %754  ;;  %v823_v61 = vld [vmem:[#allocation4 + $0x10] sm:$0xff] }
 0x133   :  { %799 = vst.msk [vmem:[#allocation4 + $0x68] sm:$0xff] %vm26_vm9, %v783_v44  ;;  %v778_v2 = vadd.f32 %v755_v31, %v698_v62  ;;  %v824_v31 = vld [vmem:[#allocation4 + $0x18] sm:$0xff]  ;;  %1203 = vrcp.f32 %v837_v0  ;;  %v607_v0 = vld [vmem:[#allocation3 + $0x68] sm:$0xff] }
 0x135   :  { %794 = vst.msk [vmem:[#allocation4 + $0x40] sm:$0xff] %vm26_vm9, %v778_v2 }
 0x136   :  { %v759_v36 = vpop.xlane.xlu0 %758 }
 0x137   :  { %v780_v13 = vadd.f32 %v759_v36, %v700_v57  ;;  %v838_v36 = vmax.f32 %v822_v29, 1.0  ;;  %v602_v29 = vld [vmem:[#allocation3 + $0x40] sm:$0xff] }
 0x139   :  { %796 = vst.msk [vmem:[#allocation4 + $0x50] sm:$0xff] %vm26_vm9, %v780_v13  ;;  %v503_v13 = vld [vmem:[#allocation2 + $0x30] sm:$0xff] }
 0x14e   :  { %v763_v6 = vpop.xlane.xlu0 %762 }
 0x14f   :  { %v782_v12 = vadd.f32 %v763_v6, %v702_v46  ;;  %v603_v46 = vld [vmem:[#allocation3 + $0x48] sm:$0xff] }
 0x151   :  { %798 = vst.msk [vmem:[#allocation4 + $0x60] sm:$0xff] %vm26_vm9, %v782_v12  ;;  %v839_v12 = vmax.f32 %v823_v61, 1.0 }
 0x16d   :  { %v631_v20 = vpop.xlane.xlu1 %630 }
 0x16e   :  { %v660_v14 = vadd.f32 %v631_v20, %v596_v8  ;;  %v825_v8 = vld [vmem:[#allocation4 + $0x20] sm:$0xff] }
 0x16f   :  { %v633_v7 = vpop.xlane.xlu0 %632 }
 0x170   :  { %v661_v49 = vadd.f32 %v633_v7, %v597_v3  ;;  %676 = vst.msk [vmem:[#allocation3 + $0x10] sm:$0xff] %vm26_vm9, %v660_v14  ;;  %v840_v3 = vmax.f32 %v824_v31, 1.0  ;;  %v826_v14 = vld [vmem:[#allocation4 + $0x28] sm:$0xff] }
 0x171   :  { %v627_v43 = vpop.xlane.xlu1 %626 }
 0x172   :  { %677 = vst.msk [vmem:[#allocation3 + $0x18] sm:$0xff] %vm26_vm9, %v661_v49  ;;  %v658_v16 = vadd.f32 %v627_v43, %v594_v15  ;;  %v501_v43 = vld [vmem:[#allocation2 + $0x20] sm:$0xff] }
 0x173   :  { %v629_v10 = vpop.xlane.xlu0 %628 }
 0x174   :  { %v659_v51 = vadd.f32 %v629_v10, %v595_v45  ;;  %674 = vst.msk [vmem:[#allocation3] sm:$0xff] %vm26_vm9, %v658_v16  ;;  %v841_v45 = vmax.f32 %v825_v8, 1.0  ;;  %v510_v10 = vld [vmem:[#allocation2 + $0x68] sm:$0xff] }
 0x175   :  { %v639_v54 = vpop.xlane.xlu1 %638  ;;  %v834_v8 = vld [vmem:[#allocation4 + $0x68] sm:$0xff] }
 0x176   :  { %675 = vst.msk [vmem:[#allocation3 + $0x8] sm:$0xff] %vm26_vm9, %v659_v51  ;;  %v664_v18 = vadd.f32 %v639_v54, %v600_v21  ;;  %v830_v51 = vld [vmem:[#allocation4 + $0x48] sm:$0xff]  ;;  %v842_v21 = vmax.f32 %v826_v14, 1.0 }
 0x177   :  { %v641_v4 = vpop.xlane.xlu0 %640  ;;  %v807_v50 = vld [vmem:[#allocation3 + $0x10] sm:$0xff] }
 0x178   :  { %v665_v23 = vadd.f32 %v641_v4, %v601_v22  ;;  %680 = vst.msk [vmem:[#allocation3 + $0x30] sm:$0xff] %vm26_vm9, %v664_v18  ;;  %v827_v4 = vld [vmem:[#allocation4 + $0x30] sm:$0xff] }
 0x179   :  { %v635_v52 = vpop.xlane.xlu1 %634 }
 0x17a   :  { %681 = vst.msk [vmem:[#allocation3 + $0x38] sm:$0xff] %vm26_vm9, %v665_v23  ;;  %v662_v28 = vadd.f32 %v635_v52, %v598_v53  ;;  %v502_v53 = vld [vmem:[#allocation2 + $0x28] sm:$0xff]  ;;  %v604_v52 = vld [vmem:[#allocation3 + $0x50] sm:$0xff] }
 0x17b   :  { %v637_v63 = vpop.xlane.xlu0 %636 }
 0x17c   :  { %v663_v35 = vadd.f32 %v637_v63, %v599_v1  ;;  %678 = vst.msk [vmem:[#allocation3 + $0x20] sm:$0xff] %vm26_vm9, %v662_v28  ;;  %v828_v1 = vld [vmem:[#allocation4 + $0x38] sm:$0xff]  ;;  %v846_v63 = vmax.f32 %v830_v51, 1.0 }
 0x17d   :  { %v534_v5 = vpop.xlane.xlu1 %533 }
 0x17e   :  { %679 = vst.msk [vmem:[#allocation3 + $0x28] sm:$0xff] %vm26_vm9, %v663_v35  ;;  %v563_v19 = vadd.f32 %v534_v5, %v499_v11  ;;  %v843_v11 = vmax.f32 %v827_v4, 1.0 }
 0x17f   :  { %v530_v40 = vpop.xlane.xlu0 %529 }
 0x180   :  { %v561_v37 = vadd.f32 %v530_v40, %v497_v38  ;;  %580 = vst.msk [vmem:[#allocation2 + $0x10] sm:$0xff] %vm26_vm9, %v563_v19  ;;  %v844_v40 = vmax.f32 %v828_v1, 1.0  ;;  %v850_v1 = vmax.f32 %v834_v8, 1.0 }
 0x181   :  { %v550_v56 = vpop.xlane.xlu1 %549 }
 0x182   :  { %578 = vst.msk [vmem:[#allocation2] sm:$0xff] %vm26_vm9, %v561_v37  ;;  %v571_v26 = vadd.f32 %v550_v56, %v507_v17  ;;  %v509_v17 = vld [vmem:[#allocation2 + $0x60] sm:$0xff]  ;;  %v1204_v56 = vpop.eup %1203 }
 0x183   :  { %v552_v48 = vpop.xlane.xlu0 %551 }
 0x184   :  { %v572_v24 = vadd.f32 %v552_v48, %v508_v58  ;;  %588 = vst.msk [vmem:[#allocation2 + $0x50] sm:$0xff] %vm26_vm9, %v571_v26  ;;  %v805_v58 = vld [vmem:[#allocation3] sm:$0xff]  ;;  %v605_v48 = vld [vmem:[#allocation3 + $0x58] sm:$0xff]  ;;  %v806_v26 = vld [vmem:[#allocation3 + $0x8] sm:$0xff] }
 0x185   :  { %v546_v27 = vpop.xlane.xlu1 %545 }
 0x186   :  { %589 = vst.msk [vmem:[#allocation2 + $0x58] sm:$0xff] %vm26_vm9, %v572_v24  ;;  %v569_v34 = vadd.f32 %v546_v27, %v505_v25  ;;  %v829_v24 = vld [vmem:[#allocation4 + $0x40] sm:$0xff] }
 0x187   :  { %v548_v47 = vpop.xlane.xlu0 %547  ;;  %v903_v16 = vld [vmem:[#allocation2 + $0x10] sm:$0xff] }
 0x188   :  { %v570_v42 = vadd.f32 %v548_v47, %v506_v9  ;;  %586 = vst.msk [vmem:[#allocation2 + $0x40] sm:$0xff] %vm26_vm9, %v569_v34  ;;  %v831_v9 = vld [vmem:[#allocation4 + $0x50] sm:$0xff] }
 0x189   :  { %v536_v55 = vpop.xlane.xlu1 %535  ;;  %v901_v6 = vld [vmem:[#allocation2] sm:$0xff]  ;;  %v847_v61 = vmax.f32 %v831_v9, 1.0 }
 0x18a   :  { %587 = vst.msk [vmem:[#allocation2 + $0x48] sm:$0xff] %vm26_vm9, %v570_v42  ;;  %v564_v59 = vadd.f32 %v536_v55, %v500_v60  ;;  %1205 = vlog2.f32 %v901_v6  ;;  %v854_v60 = vmul.f32 %v1204_v56, %v805_v58  ;;  %v832_v6 = vld [vmem:[#allocation4 + $0x58] sm:$0xff] }
 0x18b   :  { %v544_v32 = vpop.xlane.xlu0 %543  ;;  %1207 = vrcp.f32 %v838_v36  ;;  %v812_v58 = vld [vmem:[#allocation3 + $0x38] sm:$0xff] }
 0x18c   :  { %v568_v30 = vadd.f32 %v544_v32, %v504_v41  ;;  %581 = vst.msk [vmem:[#allocation2 + $0x18] sm:$0xff] %vm26_vm9, %v564_v59  ;;  %1209 = vrcp.f32 %v839_v12  ;;  %v845_v59 = vmax.f32 %v829_v24, 1.0  ;;  %v1972_v12 = vld [vmem:[#allocation4 + $0x60] sm:$0xff]  ;;  %v911_v24 = vld [vmem:[#allocation2 + $0x50] sm:$0xff] }
 0x18d   :  { %v532_v44 = vpop.xlane.xlu1 %531  ;;  %1211 = vrcp.f32 %v840_v3 }
 0x18e   :  { %585 = vst.msk [vmem:[#allocation2 + $0x38] sm:$0xff] %vm26_vm9, %v568_v30  ;;  %v562_v2 = vadd.f32 %v532_v44, %v498_v33  ;;  %1213 = vlog2.f32 %v903_v16 }
 0x18f   :  { %v767_v62 = vpop.xlane.xlu0 %766  ;;  %1215 = vrcp.f32 %v841_v45  ;;  %v809_v45 = vld [vmem:[#allocation3 + $0x20] sm:$0xff] }
 0x190   :  { %v784_v57 = vadd.f32 %v767_v62, %v704_v39  ;;  %579 = vst.msk [vmem:[#allocation2 + $0x8] sm:$0xff] %vm26_vm9, %v562_v2 }
 0x191   :  { %v542_v20 = vpop.xlane.xlu1 %541 }
 0x192   :  { %800 = vst.msk [vmem:[#allocation4 + $0x70] sm:$0xff] %vm26_vm9, %v784_v57  ;;  %v567_v49 = vadd.f32 %v542_v20, %v503_v13  ;;  %v705_v13 = vld [vmem:[#allocation4 + $0x78] sm:$0xff]  ;;  %v1104_v20 = vadd.f32 -14.285714, %v854_v60 }
 0x193   :  { %v645_v7 = vpop.xlane.xlu0 %644  ;;  %v904_v35 = vld [vmem:[#allocation2 + $0x18] sm:$0xff] }
 0x194   :  { %v667_v15 = vadd.f32 %v645_v7, %v603_v46  ;;  %584 = vst.msk [vmem:[#allocation2 + $0x30] sm:$0xff] %vm26_vm9, %v567_v49  ;;  %v1206_v25 = vpop.eup %1205  ;;  %v609_v46 = vld [vmem:[#allocation3 + $0x78] sm:$0xff] }
 0x195   :  { %v538_v22 = vpop.xlane.xlu1 %537  ;;  %v1208_v47 = vpop.eup %1207  ;;  %v908_v33 = vld [vmem:[#allocation2 + $0x38] sm:$0xff]  ;;  %v918_v62 = vmul.f32 0.6931472, %v1206_v25 }
 0x196   :  { %683 = vst.msk [vmem:[#allocation3 + $0x48] sm:$0xff] %vm26_vm9, %v667_v15  ;;  %v565_v18 = vadd.f32 %v538_v22, %v501_v43  ;;  %v1210_v41 = vpop.eup %1209  ;;  %v856_v30 = vmul.f32 %v1208_v47, %v806_v26  ;;  %v808_v15 = vld [vmem:[#allocation3 + $0x18] sm:$0xff]  ;;  %v810_v26 = vld [vmem:[#allocation3 + $0x28] sm:$0xff] }
 0x197   :  { %v556_v54 = vpop.xlane.xlu0 %555  ;;  %v902_v28 = vld [vmem:[#allocation2 + $0x8] sm:$0xff]  ;;  %v1212_v39 = vpop.eup %1211  ;;  %v858_v3 = vmul.f32 %v1210_v41, %v807_v50  ;;  %v949_v4 = vsub.f32 %v1104_v20, %v918_v62  ;;  %v912_v50 = vld [vmem:[#allocation2 + $0x58] sm:$0xff] }
 0x198   :  { %v574_v23 = vadd.f32 %v556_v54, %v510_v10  ;;  %582 = vst.msk [vmem:[#allocation2 + $0x20] sm:$0xff] %vm26_vm9, %v565_v18  ;;  %1217 = vlog2.f32 %v902_v28  ;;  %v1214_v31 = vpop.eup %1213  ;;  %v1105_v43 = vadd.f32 -14.285714, %v856_v30  ;;  %v909_v10 = vld [vmem:[#allocation2 + $0x40] sm:$0xff] }
 0x199   :  { %v540_v38 = vpop.xlane.xlu1 %539  ;;  %1219 = vrcp.f32 %v842_v21  ;;  %v1216_v2 = vpop.eup %1215  ;;  %v910_v21 = vld [vmem:[#allocation2 + $0x48] sm:$0xff]  ;;  %v922_v54 = vmul.f32 0.6931472, %v1214_v31 }
 0x19a   :  { %591 = vst.msk [vmem:[#allocation2 + $0x68] sm:$0xff] %vm26_vm9, %v574_v23  ;;  %v566_v19 = vadd.f32 %v540_v38, %v502_v53  ;;  %1221 = vlog2.f32 %v904_v35  ;;  %v848_v23 = vmax.f32 %v832_v6, 1.0  ;;  %v849_v53 = vmax.f32 %v1972_v12, 1.0  ;;  %v811_v35 = vld [vmem:[#allocation3 + $0x30] sm:$0xff] }
 0x19b   :  { %v647_v5 = vpop.xlane.xlu0 %646  ;;  %1223 = vrcp.f32 %v846_v63  ;;  %v907_v27 = vld [vmem:[#allocation2 + $0x30] sm:$0xff]  ;;  %v1106_v38 = vadd.f32 -14.285714, %v858_v3  ;;  %v862_v56 = vmul.f32 %v1216_v2, %v809_v45 }
 0x19c   :  { %v668_v37 = vadd.f32 %v647_v5, %v604_v52  ;;  %583 = vst.msk [vmem:[#allocation2 + $0x28] sm:$0xff] %vm26_vm9, %v566_v19  ;;  %1225 = vrcp.f32 %v843_v11  ;;  %v860_v11 = vmul.f32 %v1212_v39, %v808_v15  ;;  %v835_v3 = vld [vmem:[#allocation4 + $0x70] sm:$0xff] }
 0x19d   :  { %v554_v34 = vpop.xlane.xlu1 %553  ;;  %1227 = vrcp.f32 %v844_v40  ;;  %v951_v9 = vsub.f32 %v1106_v38, %v922_v54  ;;  %v1108_v39 = vadd.f32 -14.285714, %v862_v56 }
 0x19e   :  { %684 = vst.msk [vmem:[#allocation3 + $0x50] sm:$0xff] %vm26_vm9, %v668_v37  ;;  %v573_v55 = vadd.f32 %v554_v34, %v509_v17  ;;  %1229 = vlog2.f32 %v907_v27  ;;  %v511_v17 = vld [vmem:[#allocation2 + $0x70] sm:$0xff]  ;;  %v997_v27 = vsel %vm26_vm9, %v949_v4, 0.0 }
 0x19f   :  { %v649_v42 = vpop.xlane.xlu0 %648  ;;  %v905_v44 = vld [vmem:[#allocation2 + $0x20] sm:$0xff]  ;;  %v1000_v2 = vsel %vm26_vm9, %v951_v9, 0.0 }
 0x1a0   :  { %v669_v32 = vadd.f32 %v649_v42, %v605_v48  ;;  %590 = vst.msk [vmem:[#allocation2 + $0x60] sm:$0xff] %vm26_vm9, %v573_v55  ;;  %1231 = vlog2.f32 %v905_v44  ;;  %v814_v44 = vld [vmem:[#allocation3 + $0x48] sm:$0xff] }
 0x1a1   :  { %v643_v57 = vpop.xlane.xlu1 %642  ;;  %1233 = vlog2.f32 %v908_v33 }
 0x1a2   :  { %685 = vst.msk [vmem:[#allocation3 + $0x58] sm:$0xff] %vm26_vm9, %v669_v32  ;;  %v1218_v7 = vpop.eup %1217  ;;  %v666_v14 = vadd.f32 %v643_v57, %v602_v29  ;;  %1235 = vrcp.f32 %v845_v59  ;;  %v1107_v32 = vadd.f32 -14.285714, %v860_v11 }
 0x1a3   :  { %v653_v36 = vpop.xlane.xlu0 %652  ;;  %v1220_v16 = vpop.eup %1219  ;;  %1237 = vrcp.f32 %v847_v61  ;;  %v906_v51 = vld [vmem:[#allocation2 + $0x28] sm:$0xff]  ;;  %v920_v22 = vmul.f32 0.6931472, %v1218_v7 }
 0x1a4   :  { %v671_v49 = vadd.f32 %v653_v36, %v607_v0  ;;  %v1222_v18 = vpop.eup %1221  ;;  %682 = vst.msk [vmem:[#allocation3 + $0x40] sm:$0xff] %vm26_vm9, %v666_v14  ;;  %1239 = vlog2.f32 %v906_v51  ;;  %v864_v33 = vmul.f32 %v1220_v16, %v810_v26  ;;  %v512_v0 = vld [vmem:[#allocation2 + $0x78] sm:$0xff] }
 0x1a5   :  { %v1224_v52 = vpop.eup %1223  ;;  %v769_v63 = vpop.xlane.xlu1 %768  ;;  %1241 = vlog2.f32 %v909_v10  ;;  %v950_v5 = vsub.f32 %v1105_v43, %v920_v22  ;;  %v924_v25 = vmul.f32 0.6931472, %v1222_v18  ;;  %v815_v8 = vld [vmem:[#allocation3 + $0x50] sm:$0xff]  ;;  %v606_v22 = vld [vmem:[#allocation3 + $0x60] sm:$0xff] }
 0x1a6   :  { %687 = vst.msk [vmem:[#allocation3 + $0x68] sm:$0xff] %vm26_vm9, %v671_v49  ;;  %v1226_v40 = vpop.eup %1225  ;;  %v785_v19 = vadd.f32 %v769_v63, %v705_v13  ;;  %1243 = vlog2.f32 %v910_v21  ;;  %v914_v13 = vld [vmem:[#allocation2 + $0x68] sm:$0xff]  ;;  %v872_v43 = vmul.f32 %v1224_v52, %v814_v44  ;;  %v1109_v10 = vadd.f32 -14.285714, %v864_v33 }
 0x1a7   :  { %v657_v28 = vpop.xlane.xlu0 %656  ;;  %v1228_v48 = vpop.eup %1227  ;;  %v998_v47 = vsel %vm26_vm9, %v950_v5, 0.0  ;;  %v866_v34 = vmul.f32 %v1226_v40, %v811_v35  ;;  %1245 = vrcp.f32 %v848_v23  ;;  %v952_v31 = vsub.f32 %v1107_v32, %v924_v25  ;;  %v913_v16 = vld [vmem:[#allocation2 + $0x60] sm:$0xff] }
 0x1a8   :  { %v673_v37 = vadd.f32 %v657_v28, %v609_v46  ;;  %801 = vst.msk [vmem:[#allocation4 + $0x78] sm:$0xff] %vm26_vm9, %v785_v19  ;;  %v999_v42 = vadd.f32 %v998_v47, %v997_v27  ;;  %v1230_v60 = vpop.eup %1229  ;;  %v868_v55 = vmul.f32 %v1228_v48, %v812_v58  ;;  %1247 = vrcp.f32 %v850_v1  ;;  %v608_v48 = vld [vmem:[#allocation3 + $0x70] sm:$0xff] }
 0x1a9   :  { %v558_v41 = vpop.xlane.xlu1 %557  ;;  %1249 = vlog2.f32 %v911_v24  ;;  %v1110_v36 = vadd.f32 -14.285714, %v866_v34  ;;  %v930_v14 = vmul.f32 0.6931472, %v1230_v60  ;;  %v1002_v18 = vsel %vm26_vm9, %v952_v31, 0.0  ;;  %v816_v1 = vld [vmem:[#allocation3 + $0x58] sm:$0xff] }
 0x1aa   :  { %689 = vst.msk [vmem:[#allocation3 + $0x78] sm:$0xff] %vm26_vm9, %v673_v37  ;;  %v1232_v59 = vpop.eup %1231  ;;  %v575_v30 = vadd.f32 %v558_v41, %v511_v17  ;;  %1251 = vrcp.f32 %v849_v53  ;;  %v1001_v46 = vadd.f32 %v1000_v2, %v999_v42  ;;  %v1111_v7 = vadd.f32 -14.285714, %v868_v55 }
 0x1ab   :  { %v1234_v29 = vpop.eup %1233  ;;  %v813_v61 = vld [vmem:[#allocation3 + $0x40] sm:$0xff]  ;;  %v926_v62 = vmul.f32 0.6931472, %v1232_v59  ;;  %1253 = vlog2.f32 %v912_v50  ;;  %v851_v63 = vmax.f32 %v835_v3, 1.0  ;;  %v955_v40 = vsub.f32 %v1110_v36, %v930_v14 }
 0x1ac   :  { %v1236_v57 = vpop.eup %1235  ;;  %592 = vst.msk [vmem:[#allocation2 + $0x70] sm:$0xff] %vm26_vm9, %v575_v30  ;;  %v932_v51 = vmul.f32 0.6931472, %v1234_v29  ;;  %1255 = vlog2.f32 %v914_v13  ;;  %v1003_v52 = vadd.f32 %v1002_v18, %v1001_v46  ;;  %v1113_v24 = vadd.f32 -14.285714, %v872_v43 }
 0x1ad   :  { %v1238_v6 = vpop.eup %1237  ;;  %v560_v12 = vpop.xlane.xlu1 %559  ;;  %v870_v20 = vmul.f32 %v1236_v57, %v813_v61  ;;  %v953_v49 = vsub.f32 %v1108_v39, %v926_v62  ;;  %1257 = vlog2.f32 %v913_v16  ;;  %v818_v55 = vld [vmem:[#allocation3 + $0x68] sm:$0xff]  ;;  %v1008_v59 = vsel %vm26_vm9, %v955_v40, 0.0 }
 0x1ae   :  { %v1240_v15 = vpop.eup %1239  ;;  %v576_v45 = vadd.f32 %v560_v12, %v512_v0  ;;  %v874_v35 = vmul.f32 %v1238_v6, %v815_v8  ;;  %v956_v9 = vsub.f32 %v1111_v7, %v932_v51 }
 0x1af   :  { %v1242_v21 = vpop.eup %1241  ;;  %v836_v54 = vld [vmem:[#allocation4 + $0x78] sm:$0xff]  ;;  %v928_v4 = vmul.f32 0.6931472, %v1240_v15  ;;  %v1004_v23 = vsel %vm26_vm9, %v953_v49, 0.0  ;;  %v1112_v38 = vadd.f32 -14.285714, %v870_v20 }
 0x1b0   :  { %v1244_v53 = vpop.eup %1243  ;;  %593 = vst.msk [vmem:[#allocation2 + $0x78] sm:$0xff] %vm26_vm9, %v576_v45  ;;  %v852_v28 = vmax.f32 %v836_v54, 1.0  ;;  %v934_v17 = vmul.f32 0.6931472, %v1242_v21  ;;  %v1005_v58 = vadd.f32 %v1004_v23, %v1003_v52  ;;  %v1114_v32 = vadd.f32 -14.285714, %v874_v35 }
 0x1b1   :  { %v651_v11 = vpop.xlane.xlu1 %650  ;;  %v954_v5 = vsub.f32 %v1109_v10, %v928_v4  ;;  %v1246_v19 = vpop.eup %1245  ;;  %v936_v34 = vmul.f32 0.6931472, %v1244_v53  ;;  %v1010_v62 = vsel %vm26_vm9, %v956_v9, 0.0  ;;  %v820_v16 = vld [vmem:[#allocation3 + $0x78] sm:$0xff] }
 0x1b2   :  { %v670_v37 = vadd.f32 %v651_v11, %v606_v22  ;;  %1259 = vrcp.f32 %v852_v28  ;;  %v1248_v56 = vpop.eup %1247  ;;  %v876_v26 = vmul.f32 %v1246_v19, %v816_v1  ;;  %v957_v50 = vsub.f32 %v1112_v38, %v934_v17 }
 0x1b3   :  { %v915_v25 = vld [vmem:[#allocation2 + $0x70] sm:$0xff]  ;;  %v1006_v27 = vsel %vm26_vm9, %v954_v5, 0.0  ;;  %v1250_v47 = vpop.eup %1249  ;;  %1261 = vrcp.f32 %v851_v63  ;;  %v958_v44 = vsub.f32 %v1113_v24, %v936_v34  ;;  %v880_v31 = vmul.f32 %v1248_v56, %v818_v55 }
 0x1b4   :  { %686 = vst.msk [vmem:[#allocation3 + $0x60] sm:$0xff] %vm26_vm9, %v670_v37  ;;  %v1007_v42 = vadd.f32 %v1006_v27, %v1005_v58  ;;  %v1252_v60 = vpop.eup %1251  ;;  %1263 = vlog2.f32 %v915_v25  ;;  %v1115_v29 = vadd.f32 -14.285714, %v876_v26  ;;  %v938_v61 = vmul.f32 0.6931472, %v1250_v47 }
 0x1b5   :  { %v655_v41 = vpop.xlane.xlu1 %654  ;;  %v1254_v30 = vpop.eup %1253  ;;  %v1012_v46 = vsel %vm26_vm9, %v957_v50, 0.0  ;;  %v1014_v20 = vsel %vm26_vm9, %v958_v44, 0.0  ;;  %v1117_v49 = vadd.f32 -14.285714, %v880_v31 }
 0x1b6   :  { %v672_v33 = vadd.f32 %v655_v41, %v608_v48  ;;  %v1009_v39 = vadd.f32 %v1008_v59, %v1007_v42  ;;  %v1256_v57 = vpop.eup %1255  ;;  %v940_v36 = vmul.f32 0.6931472, %v1254_v30  ;;  %v959_v13 = vsub.f32 %v1114_v32, %v938_v61 }
 0x1b7   :  { %v916_v0 = vld [vmem:[#allocation2 + $0x78] sm:$0xff]  ;;  %v1258_v12 = vpop.eup %1257  ;;  %v944_v15 = vmul.f32 0.6931472, %v1256_v57 }
 0x1b8   :  { %688 = vst.msk [vmem:[#allocation3 + $0x70] sm:$0xff] %vm26_vm9, %v672_v33  ;;  %1265 = vlog2.f32 %v916_v0  ;;  %v1011_v2 = vadd.f32 %v1010_v62, %v1009_v39  ;;  %v960_v3 = vsub.f32 %v1115_v29, %v940_v36  ;;  %v1016_v43 = vsel %vm26_vm9, %v959_v13, 0.0 }
 0x1b9   :  { %v942_v21 = vmul.f32 0.6931472, %v1258_v12  ;;  %v962_v63 = vsub.f32 %v1117_v49, %v944_v15 }
 0x1ba   :  { %v1013_v6 = vadd.f32 %v1012_v46, %v1011_v2  ;;  %v1018_v23 = vsel %vm26_vm9, %v960_v3, 0.0 }
 0x1bb   :  { %v817_v8 = vld [vmem:[#allocation3 + $0x60] sm:$0xff]  ;;  %v1022_v17 = vsel %vm26_vm9, %v962_v63, 0.0 }
 0x1bc   :  { %v1260_v7 = vpop.eup %1259  ;;  %v878_v14 = vmul.f32 %v1252_v60, %v817_v8  ;;  %v1015_v45 = vadd.f32 %v1014_v20, %v1013_v6 }
 0x1bd   :  { %v1262_v10 = vpop.eup %1261  ;;  %v884_v18 = vmul.f32 %v1260_v7, %v820_v16 }
 0x1be   :  { %v1116_v51 = vadd.f32 -14.285714, %v878_v14  ;;  %v1017_v22 = vadd.f32 %v1016_v43, %v1015_v45  ;;  %v1264_v54 = vpop.eup %1263 }
 0x1bf   :  { %v819_v4 = vld [vmem:[#allocation3 + $0x70] sm:$0xff]  ;;  %v946_v11 = vmul.f32 0.6931472, %v1264_v54  ;;  %v1119_v5 = vadd.f32 -14.285714, %v884_v18 }
 0x1c0   :  { %v882_v53 = vmul.f32 %v1262_v10, %v819_v4  ;;  %v961_v1 = vsub.f32 %v1116_v51, %v942_v21  ;;  %v1019_v28 = vadd.f32 %v1018_v23, %v1017_v22 }
 0x1c2   :  { %v1266_v35 = vpop.eup %1265  ;;  %v1118_v52 = vadd.f32 -14.285714, %v882_v53  ;;  %v1020_v38 = vsel %vm26_vm9, %v961_v1, 0.0 }
 0x1c3   :  { %v948_v40 = vmul.f32 0.6931472, %v1266_v35  ;;  %v1021_v19 = vadd.f32 %v1020_v38, %v1019_v28 }
 0x1c4   :  { %v963_v37 = vsub.f32 %v1118_v52, %v946_v11 }
 0x1c5   :  { %v964_v58 = vsub.f32 %v1119_v5, %v948_v40  ;;  %v1023_v56 = vadd.f32 %v1022_v17, %v1021_v19 }
 0x1c6   :  { %v1024_v48 = vsel %vm26_vm9, %v963_v37, 0.0 }
 0x1c7   :  { %v1025_v26 = vadd.f32 %v1024_v48, %v1023_v56  ;;  %v1026_v24 = vsel %vm26_vm9, %v964_v58, 0.0 }
 0x1c9   :  { %v1027_v25 = vadd.f32 %v1026_v24, %v1025_v26 }
 0x1cb   :  { %1028 = vadd.xlane.f32.xlu1 %v1027_v25 }
 0x258   :  { %v1029_v9 = vpop.xlane.xlu1 %1028 }
 0x259   :  { %v1030_v27 = vrot.slane %v1029_v9, 4 }
 0x25b   :  { %v1031_v47 = vadd.f32 %v1030_v27, %v1029_v9 }
 0x25d   :  { %v1032_v34 = vrot.slane %v1031_v47, 2 }
 0x25f   :  { %v1033_v42 = vadd.f32 %v1032_v34, %v1031_v47 }
 0x261   :  { %v1034_v60 = vrot.slane %v1033_v42, 1 }
 0x263   :  { %v1035_v41 = vadd.f32 %v1034_v60, %v1033_v42 }
 0x265   :  { %1154 = vpush %v1035_v41 }
 0x296   :  { %s1155_s20 = spop %1154 }
 0x297   :  { %v1037_v55 = vstv %s1155_s20 }
 0x298   :  { %1038 = vst [vmem:[#allocation5] sm:$0xff] %v1037_v55 }
 0x299   :  { %1278 = shalt.err (!%p1275_p4)
}
 0x29a   :  { %s1279_s24 = scalar_lea.hbm %s2016_s5, 128 }
 0x29b   :  { %p1280_p5 = scmp.ne.s32.totalorder %s2016_s5, %s1279_s24  ;;  %p1283_p6 = scmp.lt.u32.totalorder %s1279_s24, %s2016_s5 }
 0x29d   :  { %p1285_p7 = pnand %p1283_p6, %p1280_p5 }
 0x29f   :  { %1288 = shalt.err (!%p1285_p7)
}
 0x2a0   :  { %1048 = dma.vmem_to_hbm [thread:$0]  %s1046_s19, 128, %s2016_s5, [#allocation6]  }
 0x2a1   :  { %1289 = dma.done.wait [#allocation6], 128  }
 0x2a2   :  { %1290 = vsyncadd [#allocation6], 4294967168 }
 0x2a3   :  { %1052 = vsyncpa [#allocation6], 1 }

</bundles_post_ra>
